<compile_context>
chip_gen: v7x
topology: tpu7x:2x2x1
jax: 0.10.0
libtpu: 0.0.40
codegen_flags: <defaults>
</compile_context>

<pallas_src>
import functools
import math

import jax
import jax.numpy as jnp
from jax.experimental import pallas as pl
from jax.experimental.pallas import tpu as pltpu

_EPS = 1e-5


def _round_up(x, m):
    return ((x + m - 1) // m) * m


# ---------------------------------------------------------------------------
# Pallas kernels
# ---------------------------------------------------------------------------
def _conv_bn_relu_kernel(x_ref, w_ref, b_ref, o_ref, acc_ref):
    """K-tiled (tm, tk) @ (tk, Np) matmul with fused bias + ReLU epilogue."""
    k = pl.program_id(1)

    @pl.when(k == 0)
    def _():
        acc_ref[...] = jnp.zeros_like(acc_ref)

    acc_ref[...] += jnp.dot(x_ref[...], w_ref[...],
                            preferred_element_type=jnp.float32)

    @pl.when(k == pl.num_programs(1) - 1)
    def _():
        o_ref[...] = jnp.maximum(acc_ref[...] + b_ref[...], 0.0).astype(o_ref.dtype)


def conv_bn_relu_pallas(patches, w, bias):
    """patches: (M, K) f32, w: (K, N) bf16 (BN-folded), bias: (1, N) f32."""
    M, K = patches.shape
    N = w.shape[1]

    # Tile sizes aligned to the (8, 128) vreg tiling.
    tm = min(256, _round_up(M, 8))
    Mp = _round_up(M, tm)
    Kp = _round_up(K, 128)
    tk = next(t for t in (512, 384, 256, 128) if Kp % t == 0)
    Np = _round_up(N, 128)           # lane-dense output

    # Zero padding does not change matmul / relu(x + 0) results.
    patches = jnp.pad(patches, ((0, Mp - M), (0, Kp - K))).astype(jnp.bfloat16)
    w = jnp.pad(w.astype(jnp.bfloat16), ((0, Kp - K), (0, Np - N)))
    bias = jnp.pad(bias.astype(jnp.float32), ((0, 0), (0, Np - N)))

    out = pl.pallas_call(
        _conv_bn_relu_kernel,
        out_shape=jax.ShapeDtypeStruct((Mp, Np), jnp.float32),
        grid=(Mp // tm, Kp // tk),
        in_specs=[
            pl.BlockSpec((tm, tk), lambda i, k: (i, k)),
            pl.BlockSpec((tk, Np), lambda i, k: (k, 0)),
            pl.BlockSpec((1, Np), lambda i, k: (0, 0)),
        ],
        out_specs=pl.BlockSpec((tm, Np), lambda i, k: (i, 0)),
        scratch_shapes=[pltpu.VMEM((tm, Np), jnp.float32)],
        compiler_params=pltpu.CompilerParams(
            dimension_semantics=("parallel", "arbitrary")),
    )(patches, w, bias)
    return out[:M, :N]


def _maxpool_kernel(a_ref, b_ref, c_ref, d_ref, o_ref):
    o_ref[...] = jnp.maximum(jnp.maximum(a_ref[...], b_ref[...]),
                             jnp.maximum(c_ref[...], d_ref[...]))


def maxpool2x2_pallas(x):
    """x: (N, H, W, C) NHWC -> (N, H//2, W//2, C); elementwise max of 4 taps."""
    n, h, w, c = x.shape
    ho, wo = h // 2, w // 2
    x = x[:, :2 * ho, :2 * wo, :]
    x5 = x.reshape(n, ho, 2, wo, 2, c)
    slabs = [x5[:, :, i, :, j, :].reshape(n * ho, wo * c)
             for i in range(2) for j in range(2)]
    rows, cols = n * ho, wo * c
    spec = pl.BlockSpec((rows, cols), lambda i: (0, 0))
    out = pl.pallas_call(
        _maxpool_kernel,
        out_shape=jax.ShapeDtypeStruct((rows, cols), x.dtype),
        grid=(1,),
        in_specs=[spec] * 4,
        out_specs=spec,
    )(*slabs)
    return out.reshape(n, ho, wo, c)


# ---------------------------------------------------------------------------
# Reference (pure jnp) path for correctness checking
# ---------------------------------------------------------------------------
def conv_bn_relu_ref(patches, w, bias):
    out = patches @ w.astype(jnp.float32) + bias
    return jnp.maximum(out, 0.0)


def maxpool2x2_ref(x):
    n, h, w, c = x.shape
    ho, wo = h // 2, w // 2
    x = x[:, :2 * ho, :2 * wo, :]
    return jnp.max(x.reshape(n, ho, 2, wo, 2, c), axis=(2, 4))


# ---------------------------------------------------------------------------
# Glue (im2col, parameter setup, forward)
# ---------------------------------------------------------------------------
def im2col(x, ksize, stride, pad):
    """x: NHWC -> ((N*Ho*Wo, ksize*ksize*C) patch matrix, (N, Ho, Wo))."""
    N, H, W, C = x.shape
    if pad:
        x = jnp.pad(x, ((0, 0), (pad, pad), (pad, pad), (0, 0)))
    Ho = (H + 2 * pad - ksize) // stride + 1
    Wo = (W + 2 * pad - ksize) // stride + 1
    cols = []
    for i in range(ksize):
        for j in range(ksize):
            cols.append(x[:, i:i + stride * Ho:stride, j:j + stride * Wo:stride, :])
    patches = jnp.concatenate(cols, axis=-1)
    return patches.reshape(N * Ho * Wo, ksize * ksize * C), (N, Ho, Wo)


def make_params(key, in_ch, out_ch):
    """Conv weights as (kh*kw*Cin, Cout) matmul matrices with eval-mode BN
    folded in; weights stored in bf16 (HBM traffic), biases in f32."""
    k1, k2, k3, k4 = jax.random.split(key, 4)

    def conv_linear(kw_, kb_, kh, kw, cin, cout):
        fan_in = kh * kw * cin
        bound = 1.0 / math.sqrt(fan_in)   # PyTorch Conv2d default init
        w = jax.random.uniform(kw_, (fan_in, cout), jnp.float32, -bound, bound)
        b = jax.random.uniform(kb_, (cout,), jnp.float32, -bound, bound)
        return w, b

    # Per-conv BN folding (default running stats / affine params).
    gamma, beta, mean, var = 1.0, 0.0, 0.0, 1.0
    scale = gamma / math.sqrt(var + _EPS)

    w1, b1 = conv_linear(k1, k2, 3, 3, in_ch, out_ch)
    w2, b2 = conv_linear(k3, k4, 3, 3, out_ch, out_ch)
    return {
        'w1': (w1 * scale).astype(jnp.bfloat16),
        'b1': ((b1 - mean) * scale + beta).reshape(1, -1),
        'w2': (w2 * scale).astype(jnp.bfloat16),
        'b2': ((b2 - mean) * scale + beta).reshape(1, -1),
    }


def down_forward(x_nchw, p, use_pallas=True):
    x = jnp.transpose(x_nchw, (0, 2, 3, 1)).astype(jnp.float32)   # NCHW -> NHWC

    # MaxPool2d(2)
    pooled = maxpool2x2_pallas(x) if use_pallas else maxpool2x2_ref(x)

    conv = conv_bn_relu_pallas if use_pallas else conv_bn_relu_ref

    # conv3x3(pad=1) -> BN -> ReLU
    patches, (n, ho, wo) = im2col(pooled, 3, 1, 1)
    h = conv(patches, p['w1'], p['b1'])

    # conv3x3(pad=1) -> BN -> ReLU
    p2, _ = im2col(h.reshape(n, ho, wo, -1), 3, 1, 1)
    h = conv(p2, p['w2'], p['b2'])

    y = h.reshape(n, ho, wo, -1)
    return jnp.transpose(y, (0, 3, 1, 2))                         # NHWC -> NCHW


if __name__ == "__main__":
    key = jax.random.PRNGKey(0)
    kx, kp = jax.random.split(key)

    N, Cin, H, W = 2, 8, 32, 32
    Cout = 64
    x = jax.random.normal(kx, (N, Cin, H, W), jnp.float32)
    params = make_params(kp, Cin, Cout)

    fwd = jax.jit(functools.partial(down_forward, use_pallas=True))
    out = jax.block_until_ready(fwd(x, params))

    ref = down_forward(x, params, use_pallas=False)
    assert out.shape == (N, Cout, H // 2, W // 2), out.shape
    assert bool(jnp.all(jnp.isfinite(out)))
    assert bool(jnp.allclose(out, ref, rtol=5e-2, atol=5e-2))

    print("KERNEL_OK")
</pallas_src>

<mosaic_0001>
module attributes {stable_mosaic.version = 11 : i64} {
  func.func @_maxpool_kernel(%arg0: i32, %arg1: memref<32x128xf32, #tpu.memory_space<vmem>>, %arg2: memref<32x128xf32, #tpu.memory_space<vmem>>, %arg3: memref<32x128xf32, #tpu.memory_space<vmem>>, %arg4: memref<32x128xf32, #tpu.memory_space<vmem>>, %arg5: memref<32x128xf32, #tpu.memory_space<vmem>>) attributes {dimension_semantics = [#tpu.dimension_semantics<arbitrary>], iteration_bounds = array<i64: 1>, scalar_prefetch = 0 : i64, scratch_operands = 0 : i64, tpu.core_type = #tpu.core_type<tc>, window_params = [{pipeline_mode = #tpu.pipeline_mode<synchronous>, transform_indices = @transform_0, window_bounds = array<i64: 32, 128>}, {pipeline_mode = #tpu.pipeline_mode<synchronous>, transform_indices = @transform_1, window_bounds = array<i64: 32, 128>}, {pipeline_mode = #tpu.pipeline_mode<synchronous>, transform_indices = @transform_2, window_bounds = array<i64: 32, 128>}, {pipeline_mode = #tpu.pipeline_mode<synchronous>, transform_indices = @transform_3, window_bounds = array<i64: 32, 128>}, {pipeline_mode = #tpu.pipeline_mode<synchronous>, transform_indices = @transform_4, window_bounds = array<i64: 32, 128>}]} {
    %c0 = arith.constant 0 : index
    %c0_0 = arith.constant 0 : index
    %0 = vector.load %arg1[%c0, %c0_0] : memref<32x128xf32, #tpu.memory_space<vmem>>, vector<32x128xf32>
    %c0_1 = arith.constant 0 : index
    %c0_2 = arith.constant 0 : index
    %1 = vector.load %arg2[%c0_1, %c0_2] : memref<32x128xf32, #tpu.memory_space<vmem>>, vector<32x128xf32>
    %2 = arith.maximumf %0, %1 : vector<32x128xf32>
    %c0_3 = arith.constant 0 : index
    %c0_4 = arith.constant 0 : index
    %3 = vector.load %arg3[%c0_3, %c0_4] : memref<32x128xf32, #tpu.memory_space<vmem>>, vector<32x128xf32>
    %c0_5 = arith.constant 0 : index
    %c0_6 = arith.constant 0 : index
    %4 = vector.load %arg4[%c0_5, %c0_6] : memref<32x128xf32, #tpu.memory_space<vmem>>, vector<32x128xf32>
    %5 = arith.maximumf %3, %4 : vector<32x128xf32>
    %6 = arith.maximumf %2, %5 : vector<32x128xf32>
    %c0_7 = arith.constant 0 : index
    %c0_8 = arith.constant 0 : index
    %7 = vector.load %arg5[%c0_7, %c0_8] : memref<32x128xf32, #tpu.memory_space<vmem>>, vector<32x128xf32>
    tpu.vector_store %arg5[%c0_7, %c0_8], %6 {strides = array<i32>} : memref<32x128xf32, #tpu.memory_space<vmem>>, vector<32x128xf32>,
    return
  }
  func.func @transform_0(%arg0: i32) -> (i32, i32) {
    %c0_i32 = arith.constant 0 : i32
    %c0_i32_0 = arith.constant 0 : i32
    %c0_i32_1 = arith.constant 0 : i32
    return %c0_i32, %c0_i32_0 : i32, i32
  }
  func.func @transform_1(%arg0: i32) -> (i32, i32) {
    %c0_i32 = arith.constant 0 : i32
    %c0_i32_0 = arith.constant 0 : i32
    %c0_i32_1 = arith.constant 0 : i32
    return %c0_i32, %c0_i32_0 : i32, i32
  }
  func.func @transform_2(%arg0: i32) -> (i32, i32) {
    %c0_i32 = arith.constant 0 : i32
    %c0_i32_0 = arith.constant 0 : i32
    %c0_i32_1 = arith.constant 0 : i32
    return %c0_i32, %c0_i32_0 : i32, i32
  }
  func.func @transform_3(%arg0: i32) -> (i32, i32) {
    %c0_i32 = arith.constant 0 : i32
    %c0_i32_0 = arith.constant 0 : i32
    %c0_i32_1 = arith.constant 0 : i32
    return %c0_i32, %c0_i32_0 : i32, i32
  }
  func.func @transform_4(%arg0: i32) -> (i32, i32) {
    %c0_i32 = arith.constant 0 : i32
    %c0_i32_0 = arith.constant 0 : i32
    %c0_i32_1 = arith.constant 0 : i32
    return %c0_i32, %c0_i32_0 : i32, i32
  }
}

module attributes {stable_mosaic.version = 11 : i64} {
  func.func @_conv_bn_relu_kernel(%arg0: i32, %arg1: i32, %arg2: memref<256x128xbf16, #tpu.memory_space<vmem>>, %arg3: memref<128x128xbf16, #tpu.memory_space<vmem>>, %arg4: memref<1x128xf32, #tpu.memory_space<vmem>>, %arg5: memref<256x128xf32, #tpu.memory_space<vmem>>, %arg6: memref<256x128xf32, #tpu.memory_space<vmem>>) attributes {dimension_semantics = [#tpu.dimension_semantics<parallel>, #tpu.dimension_semantics<arbitrary>], iteration_bounds = array<i64: 2, 1>, scalar_prefetch = 0 : i64, scratch_operands = 1 : i64, tpu.core_type = #tpu.core_type<tc>, window_params = [{transform_indices = @transform_0, window_bounds = array<i64: 256, 128>}, {transform_indices = @transform_1, window_bounds = array<i64: 128, 128>}, {pipeline_mode = #tpu.pipeline_mode<synchronous>, transform_indices = @transform_2, window_bounds = array<i64: 1, 128>}, {transform_indices = @transform_3, window_bounds = array<i64: 256, 128>}]} {
    %c0_i32 = arith.constant 0 : i32
    %0 = arith.cmpi eq, %arg1, %c0_i32 : i32
    %1 = arith.extui %0 : i1 to i32
    %c0_i32_0 = arith.constant 0 : i32
    %2 = arith.cmpi ne, %1, %c0_i32_0 : i32
    scf.if %2 {
      %cst_10 = arith.constant 0.000000e+00 : f32
      %12 = vector.broadcast %cst_10 : f32 to vector<256x128xf32>
      %c0_11 = arith.constant 0 : index
      %c0_12 = arith.constant 0 : index
      %13 = vector.load %arg6[%c0_11, %c0_12] : memref<256x128xf32, #tpu.memory_space<vmem>>, vector<256x128xf32>
      tpu.vector_store %arg6[%c0_11, %c0_12], %12 {strides = array<i32>} : memref<256x128xf32, #tpu.memory_space<vmem>>, vector<256x128xf32>,
    } else {
    }
    %c0 = arith.constant 0 : index
    %c0_1 = arith.constant 0 : index
    %3 = vector.load %arg6[%c0, %c0_1] : memref<256x128xf32, #tpu.memory_space<vmem>>, vector<256x128xf32>
    %c0_2 = arith.constant 0 : index
    %c0_3 = arith.constant 0 : index
    %4 = vector.load %arg2[%c0_2, %c0_3] : memref<256x128xbf16, #tpu.memory_space<vmem>>, vector<256x128xbf16>
    %c0_4 = arith.constant 0 : index
    %c0_5 = arith.constant 0 : index
    %5 = vector.load %arg3[%c0_4, %c0_5] : memref<128x128xbf16, #tpu.memory_space<vmem>>, vector<128x128xbf16>
    %cst = arith.constant dense<0.000000e+00> : vector<256x128xf32>
    %6 = tpu.matmul %4, %5, %cst {dimension_numbers = #tpu.dot_dimension_numbers<[1], [0], [0], [1], [0, 0, 1, 1], [], []>} : vector<256x128xbf16>, vector<128x128xbf16>, vector<256x128xf32> -> vector<256x128xf32>
    %7 = arith.addf %3, %6 : vector<256x128xf32>
    %c0_6 = arith.constant 0 : index
    %c0_7 = arith.constant 0 : index
    %8 = vector.load %arg6[%c0_6, %c0_7] : memref<256x128xf32, #tpu.memory_space<vmem>>, vector<256x128xf32>
    tpu.vector_store %arg6[%c0_6, %c0_7], %7 {strides = array<i32>} : memref<256x128xf32, #tpu.memory_space<vmem>>, vector<256x128xf32>,
    %c0_i32_8 = arith.constant 0 : i32
    %9 = arith.cmpi eq, %arg1, %c0_i32_8 : i32
    %10 = arith.extui %9 : i1 to i32
    %c0_i32_9 = arith.constant 0 : i32
    %11 = arith.cmpi ne, %10, %c0_i32_9 : i32
    scf.if %11 {
      %c0_10 = arith.constant 0 : index
      %c0_11 = arith.constant 0 : index
      %12 = vector.load %arg6[%c0_10, %c0_11] : memref<256x128xf32, #tpu.memory_space<vmem>>, vector<256x128xf32>
      %c0_12 = arith.constant 0 : index
      %c0_13 = arith.constant 0 : index
      %13 = vector.load %arg4[%c0_12, %c0_13] : memref<1x128xf32, #tpu.memory_space<vmem>>, vector<1x128xf32>
      %14 = vector.broadcast %13 : vector<1x128xf32> to vector<256x128xf32>
      %15 = arith.addf %12, %14 : vector<256x128xf32>
      %cst_14 = arith.constant 0.000000e+00 : f32
      %16 = vector.broadcast %cst_14 : f32 to vector<256x128xf32>
      %17 = arith.maximumf %15, %16 : vector<256x128xf32>
      %c0_15 = arith.constant 0 : index
      %c0_16 = arith.constant 0 : index
      %18 = vector.load %arg5[%c0_15, %c0_16] : memref<256x128xf32, #tpu.memory_space<vmem>>, vector<256x128xf32>
      tpu.vector_store %arg5[%c0_15, %c0_16], %17 {strides = array<i32>} : memref<256x128xf32, #tpu.memory_space<vmem>>, vector<256x128xf32>,
    } else {
    }
    return
  }
  func.func @transform_0(%arg0: i32, %arg1: i32) -> (i32, i32) {
    %c0_i32 = arith.constant 0 : i32
    return %arg0, %arg1 : i32, i32
  }
  func.func @transform_1(%arg0: i32, %arg1: i32) -> (i32, i32) {
    %c0_i32 = arith.constant 0 : i32
    %c0_i32_0 = arith.constant 0 : i32
    return %arg1, %c0_i32 : i32, i32
  }
  func.func @transform_2(%arg0: i32, %arg1: i32) -> (i32, i32) {
    %c0_i32 = arith.constant 0 : i32
    %c0_i32_0 = arith.constant 0 : i32
    %c0_i32_1 = arith.constant 0 : i32
    return %c0_i32, %c0_i32_0 : i32, i32
  }
  func.func @transform_3(%arg0: i32, %arg1: i32) -> (i32, i32) {
    %c0_i32 = arith.constant 0 : i32
    %c0_i32_0 = arith.constant 0 : i32
    return %arg0, %c0_i32 : i32, i32
  }
}

module attributes {stable_mosaic.version = 11 : i64} {
  func.func @_conv_bn_relu_kernel(%arg0: i32, %arg1: i32, %arg2: memref<256x128xbf16, #tpu.memory_space<vmem>>, %arg3: memref<128x128xbf16, #tpu.memory_space<vmem>>, %arg4: memref<1x128xf32, #tpu.memory_space<vmem>>, %arg5: memref<256x128xf32, #tpu.memory_space<vmem>>, %arg6: memref<256x128xf32, #tpu.memory_space<vmem>>) attributes {dimension_semantics = [#tpu.dimension_semantics<parallel>, #tpu.dimension_semantics<arbitrary>], iteration_bounds = array<i64: 2, 5>, scalar_prefetch = 0 : i64, scratch_operands = 1 : i64, tpu.core_type = #tpu.core_type<tc>, window_params = [{transform_indices = @transform_0, window_bounds = array<i64: 256, 128>}, {transform_indices = @transform_1, window_bounds = array<i64: 128, 128>}, {pipeline_mode = #tpu.pipeline_mode<synchronous>, transform_indices = @transform_2, window_bounds = array<i64: 1, 128>}, {transform_indices = @transform_3, window_bounds = array<i64: 256, 128>}]} {
    %c0_i32 = arith.constant 0 : i32
    %0 = arith.cmpi eq, %arg1, %c0_i32 : i32
    %1 = arith.extui %0 : i1 to i32
    %c0_i32_0 = arith.constant 0 : i32
    %2 = arith.cmpi ne, %1, %c0_i32_0 : i32
    scf.if %2 {
      %cst_9 = arith.constant 0.000000e+00 : f32
      %12 = vector.broadcast %cst_9 : f32 to vector<256x128xf32>
      %c0_10 = arith.constant 0 : index
      %c0_11 = arith.constant 0 : index
      %13 = vector.load %arg6[%c0_10, %c0_11] : memref<256x128xf32, #tpu.memory_space<vmem>>, vector<256x128xf32>
      tpu.vector_store %arg6[%c0_10, %c0_11], %12 {strides = array<i32>} : memref<256x128xf32, #tpu.memory_space<vmem>>, vector<256x128xf32>,
    } else {
    }
    %c0 = arith.constant 0 : index
    %c0_1 = arith.constant 0 : index
    %3 = vector.load %arg6[%c0, %c0_1] : memref<256x128xf32, #tpu.memory_space<vmem>>, vector<256x128xf32>
    %c0_2 = arith.constant 0 : index
    %c0_3 = arith.constant 0 : index
    %4 = vector.load %arg2[%c0_2, %c0_3] : memref<256x128xbf16, #tpu.memory_space<vmem>>, vector<256x128xbf16>
    %c0_4 = arith.constant 0 : index
    %c0_5 = arith.constant 0 : index
    %5 = vector.load %arg3[%c0_4, %c0_5] : memref<128x128xbf16, #tpu.memory_space<vmem>>, vector<128x128xbf16>
    %cst = arith.constant dense<0.000000e+00> : vector<256x128xf32>
    %6 = tpu.matmul %4, %5, %cst {dimension_numbers = #tpu.dot_dimension_numbers<[1], [0], [0], [1], [0, 0, 1, 1], [], []>} : vector<256x128xbf16>, vector<128x128xbf16>, vector<256x128xf32> -> vector<256x128xf32>
    %7 = arith.addf %3, %6 : vector<256x128xf32>
    %c0_6 = arith.constant 0 : index
    %c0_7 = arith.constant 0 : index
    %8 = vector.load %arg6[%c0_6, %c0_7] : memref<256x128xf32, #tpu.memory_space<vmem>>, vector<256x128xf32>
    tpu.vector_store %arg6[%c0_6, %c0_7], %7 {strides = array<i32>} : memref<256x128xf32, #tpu.memory_space<vmem>>, vector<256x128xf32>,
    %c4_i32 = arith.constant 4 : i32
    %9 = arith.cmpi eq, %arg1, %c4_i32 : i32
    %10 = arith.extui %9 : i1 to i32
    %c0_i32_8 = arith.constant 0 : i32
    %11 = arith.cmpi ne, %10, %c0_i32_8 : i32
    scf.if %11 {
      %c0_9 = arith.constant 0 : index
      %c0_10 = arith.constant 0 : index
      %12 = vector.load %arg6[%c0_9, %c0_10] : memref<256x128xf32, #tpu.memory_space<vmem>>, vector<256x128xf32>
      %c0_11 = arith.constant 0 : index
      %c0_12 = arith.constant 0 : index
      %13 = vector.load %arg4[%c0_11, %c0_12] : memref<1x128xf32, #tpu.memory_space<vmem>>, vector<1x128xf32>
      %14 = vector.broadcast %13 : vector<1x128xf32> to vector<256x128xf32>
      %15 = arith.addf %12, %14 : vector<256x128xf32>
      %cst_13 = arith.constant 0.000000e+00 : f32
      %16 = vector.broadcast %cst_13 : f32 to vector<256x128xf32>
      %17 = arith.maximumf %15, %16 : vector<256x128xf32>
      %c0_14 = arith.constant 0 : index
      %c0_15 = arith.constant 0 : index
      %18 = vector.load %arg5[%c0_14, %c0_15] : memref<256x128xf32, #tpu.memory_space<vmem>>, vector<256x128xf32>
      tpu.vector_store %arg5[%c0_14, %c0_15], %17 {strides = array<i32>} : memref<256x128xf32, #tpu.memory_space<vmem>>, vector<256x128xf32>,
    } else {
    }
    return
  }
  func.func @transform_0(%arg0: i32, %arg1: i32) -> (i32, i32) {
    %c0_i32 = arith.constant 0 : i32
    return %arg0, %arg1 : i32, i32
  }
  func.func @transform_1(%arg0: i32, %arg1: i32) -> (i32, i32) {
    %c0_i32 = arith.constant 0 : i32
    %c0_i32_0 = arith.constant 0 : i32
    return %arg1, %c0_i32 : i32, i32
  }
  func.func @transform_2(%arg0: i32, %arg1: i32) -> (i32, i32) {
    %c0_i32 = arith.constant 0 : i32
    %c0_i32_0 = arith.constant 0 : i32
    %c0_i32_1 = arith.constant 0 : i32
    return %c0_i32, %c0_i32_0 : i32, i32
  }
  func.func @transform_3(%arg0: i32, %arg1: i32) -> (i32, i32) {
    %c0_i32 = arith.constant 0 : i32
    %c0_i32_0 = arith.constant 0 : i32
    return %arg0, %c0_i32 : i32, i32
  }
}

</mosaic_0001>

<bundles_post_ra>
// kernel: down_forward.3
= control target key start
LH: loop header
LB: loop body
LE: loop exit
PB: predicated region body
PF: predicated region fallthrough
CT: control target
= control target key end

     0   :  { %s138_s0 = inlined_call_operand.vmem [shape: f32[32,128], index: 0, kind: input, shape index: {}]   ;;  %s139_s1 = inlined_call_operand.vmem [shape: f32[32,128], index: 1, kind: input, shape index: {}]   ;;  %s140_s2 = inlined_call_operand.vmem [shape: f32[32,128], index: 2, kind: input, shape index: {}]   ;;  %s141_s3 = inlined_call_operand.vmem [shape: f32[32,128], index: 3, kind: input, shape index: {}]   ;;  %s142_s4 = inlined_call_operand.vmem [shape: f32[32,128], index: 4, kind: output, shape index: {}]  }
   0x1   :  { %v17_v0 = vld [vmem:[%s138_s0] sm:$0xff]  ;;  %v18_v5 = vld [vmem:[%s138_s0 + $0x8] sm:$0xff]  ;;  %v19_v11 = vld [vmem:[%s138_s0 + $0x10] sm:$0xff] }
   0x2   :  { %v21_v1 = vld [vmem:[%s139_s1] sm:$0xff]  ;;  %v22_v6 = vld [vmem:[%s139_s1 + $0x8] sm:$0xff]  ;;  %v23_v13 = vld [vmem:[%s139_s1 + $0x10] sm:$0xff] }
   0x3   :  { %v29_v2 = vld [vmem:[%s140_s2] sm:$0xff]  ;;  %v25_v3 = vmax.f32 %v17_v0, %v21_v1  ;;  %v26_v8 = vmax.f32 %v18_v5, %v22_v6  ;;  %v30_v9 = vld [vmem:[%s140_s2 + $0x8] sm:$0xff]  ;;  %v31_v14 = vld [vmem:[%s140_s2 + $0x10] sm:$0xff]  ;;  %v27_v17 = vmax.f32 %v19_v11, %v23_v13 }
   0x4   :  { %v33_v4 = vld [vmem:[%s141_s3] sm:$0xff]  ;;  %v34_v10 = vld [vmem:[%s141_s3 + $0x8] sm:$0xff]  ;;  %v35_v15 = vld [vmem:[%s141_s3 + $0x10] sm:$0xff] }
   0x5   :  { %v37_v7 = vmax.f32 %v29_v2, %v33_v4  ;;  %v38_v12 = vmax.f32 %v30_v9, %v34_v10  ;;  %v39_v18 = vmax.f32 %v31_v14, %v35_v15  ;;  %v20_v19 = vld [vmem:[%s138_s0 + $0x18] sm:$0xff] }
   0x6   :  { %v24_v20 = vld [vmem:[%s139_s1 + $0x18] sm:$0xff] }
   0x7   :  { %v41_v16 = vmax.f32 %v25_v3, %v37_v7  ;;  %v32_v21 = vld [vmem:[%s140_s2 + $0x18] sm:$0xff]  ;;  %v42_v22 = vmax.f32 %v26_v8, %v38_v12  ;;  %v28_v23 = vmax.f32 %v20_v19, %v24_v20  ;;  %v43_v25 = vmax.f32 %v27_v17, %v39_v18 }
   0x8   :  { %v36_v24 = vld [vmem:[%s141_s3 + $0x18] sm:$0xff] }
   0x9   :  { %45 = vst [vmem:[%s142_s4] sm:$0xff] %v41_v16  ;;  %v40_v26 = vmax.f32 %v32_v21, %v36_v24  ;;  %46 = vst [vmem:[%s142_s4 + $0x8] sm:$0xff] %v42_v22 }
   0xa   :  { %47 = vst [vmem:[%s142_s4 + $0x10] sm:$0xff] %v43_v25 }
   0xb   :  { %v44_v27 = vmax.f32 %v28_v23, %v40_v26 }
   0xd   :  { %48 = vst [vmem:[%s142_s4 + $0x18] sm:$0xff] %v44_v27 }

// kernel: down_forward.4
= control target key start
LH: loop header
LB: loop body
LE: loop exit
PB: predicated region body
PF: predicated region fallthrough
CT: control target
= control target key end

     0   :  { %s1143_s12 = smov 0   ;;  %s1145_s13 = smov 0   ;;  %s1293_s0 = inlined_call_operand.vmem [shape: bf16[512,128], index: 0, kind: input, shape index: {}]   ;;  %s1294_s1 = inlined_call_operand.vmem [shape: bf16[128,128], index: 1, kind: input, shape index: {}]   ;;  %s1295_s2 = inlined_call_operand.vmem [shape: f32[1,128], index: 2, kind: input, shape index: {}]   ;;  %s1296_s3 = inlined_call_operand.vmem [shape: f32[512,128], index: 3, kind: output, shape index: {}]  }
   0x1   :  { %s1147_s14 = smov 0  }
   0x2 LB: > { %s25_s15 = sadd.s32 1, %s1117_s13  ;;  %p931_p0 = scmp.ge.s32.totalorder %s1121_s14, 1  ;;  %s1121_s14 = sphi %s1147_s14, %s13_s14   ;;  %s1117_s13 = sphi %s1145_s13, %s1298_s13   ;;  %s1113_s12 = sphi %s1143_s12, %s1297_s12  }
   0x3   : > { %p27_p1 = scmp.ge.s32.totalorder %s25_s15, 2  ;;  %p166_p2 = scmp.lt.s32.totalorder %s1121_s14, 3 }
   0x5   : > { %s1300_s15 = smov (%p27_p1, %s25_s15), 0  ;;  %p167_p3 = pnand %p931_p0, %p166_p2 }
   0x6   : > { %v1075_v0 = vld [vmem:[%s1294_s1] sm:$0xff] (!%p167_p3)   ;;  %s932_s18 = sshll.u32 (!%p167_p3), %s1113_s12, 5  ;;  %v1076_v1 = vld [vmem:[%s1294_s1 + $0x8] sm:$0xff] (!%p167_p3)   ;;  %v1077_v2 = vld [vmem:[%s1294_s1 + $0x10] sm:$0xff] (!%p167_p3)  }
   0x7   : > { %170 = sbr.rel (%p167_p3) target bundleno = 283 (0x11b), region = 32  ;;  %p199_p4 = scmp.lt.s32.totalorder (!%p167_p3), %s932_s18, 63  ;;  %987 = vmatprep.subr.bf16.mxu0 (!%p167_p3), %v1075_v0  ;;  %1035 = vmatprep.subr.bf16.mxu1 (!%p167_p3), %v1075_v0  ;;  %v1078_v3 = vld [vmem:[%s1294_s1 + $0x18] sm:$0xff] (!%p167_p3)   ;;  %v1079_v6 = vld [vmem:[%s1294_s1 + $0x20] sm:$0xff] (!%p167_p3)   ;;  %v1080_v7 = vld [vmem:[%s1294_s1 + $0x28] sm:$0xff] (!%p167_p3)  }
   0x8   : > { %988 = vmatpush3.bf16.msra.mxu0 (!%p167_p3), %v1075_v0  ;;  %1043 = vmatpush3.bf16.msra.mxu1 (!%p167_p3), %v1075_v0  ;;  %v1081_v8 = vld [vmem:[%s1294_s1 + $0x30] sm:$0xff] (!%p167_p3)   ;;  %v1082_v9 = vld [vmem:[%s1294_s1 + $0x38] sm:$0xff] (!%p167_p3)   ;;  %v1212_v24 = vld [vmem:[%s1295_s2] ss:$0 sm:$0xff] (!%p167_p3) }
   0x9   : > { %989 = vmatprep.subr.bf16.mxu0 (!%p167_p3), %v1076_v1  ;;  %1036 = vmatprep.subr.bf16.mxu1 (!%p167_p3), %v1076_v1 }
   0xc   : > { %990 = vmatpush3.bf16.msra.mxu0 (!%p167_p3), %v1076_v1  ;;  %1044 = vmatpush3.bf16.msra.mxu1 (!%p167_p3), %v1076_v1 }
   0xd   : > { %991 = vmatprep.subr.bf16.mxu0 (!%p167_p3), %v1077_v2  ;;  %1037 = vmatprep.subr.bf16.mxu1 (!%p167_p3), %v1077_v2 }
   0xe   : > { %s1302_s18 = smov (!%p199_p4, %s932_s18), 63 }
   0xf   : > { %s933_s23 = sshll.u32 %s1302_s18, 2  ;;  %s935_s12 = sshll.u32 %s1302_s18, 3 }
  0x10   : > { %s1176_s26 = scalar_lea.vmem %s1293_s0, %s933_s23  ;;  %992 = vmatpush3.bf16.msra.mxu0 %v1077_v2  ;;  %1045 = vmatpush3.bf16.msra.mxu1 %v1077_v2  ;;  %s1220_s19 = scalar_lea.vmem %s1296_s3, %s935_s12 }
  0x11   : > { %v1083_v4 = vld [vmem:[%s1176_s26] sm:$0xff]   ;;  %993 = vmatprep.subr.bf16.mxu0 %v1078_v3  ;;  %1038 = vmatprep.subr.bf16.mxu1 %v1078_v3  ;;  %v1085_v10 = vld [vmem:[%s1176_s26 + $0x8] sm:$0xff]   ;;  %v1087_v12 = vld [vmem:[%s1176_s26 + $0x10] sm:$0xff]  }
  0x12   : > { %v1084_v5 = vld [vmem:[%s1176_s26 + $0x40] sm:$0xff]   ;;  %1003 = vmatprep.mubr.bf16.mxu0 %v1083_v4  ;;  %v1086_v11 = vld [vmem:[%s1176_s26 + $0x48] sm:$0xff]   ;;  %v1088_v13 = vld [vmem:[%s1176_s26 + $0x50] sm:$0xff]  }
  0x13   : > { %1019 = vmatprep.mubr.bf16.mxu1 %v1084_v5  ;;  %v1089_v14 = vld [vmem:[%s1176_s26 + $0x18] sm:$0xff]   ;;  %v1091_v16 = vld [vmem:[%s1176_s26 + $0x20] sm:$0xff]   ;;  %v1093_v18 = vld [vmem:[%s1176_s26 + $0x28] sm:$0xff]  }
  0x14   : > { %994 = vmatpush3.bf16.msra.mxu0 %v1078_v3  ;;  %1046 = vmatpush3.bf16.msra.mxu1 %v1078_v3  ;;  %v1090_v15 = vld [vmem:[%s1176_s26 + $0x58] sm:$0xff]   ;;  %v1092_v17 = vld [vmem:[%s1176_s26 + $0x60] sm:$0xff]   ;;  %v1094_v19 = vld [vmem:[%s1176_s26 + $0x68] sm:$0xff]  }
  0x15   : > { %995 = vmatprep.subr.bf16.mxu0 %v1079_v6  ;;  %1039 = vmatprep.subr.bf16.mxu1 %v1079_v6  ;;  %v1095_v20 = vld [vmem:[%s1176_s26 + $0x30] sm:$0xff]   ;;  %v1097_v22 = vld [vmem:[%s1176_s26 + $0x38] sm:$0xff]  }
  0x16   : > { %v1096_v21 = vld [vmem:[%s1176_s26 + $0x70] sm:$0xff]   ;;  %v1098_v23 = vld [vmem:[%s1176_s26 + $0x78] sm:$0xff]  }
  0x18   : > { %996 = vmatpush3.bf16.msra.mxu0 %v1079_v6  ;;  %1047 = vmatpush3.bf16.msra.mxu1 %v1079_v6 }
  0x19   : > { %997 = vmatprep.subr.bf16.mxu0 %v1080_v7  ;;  %1040 = vmatprep.subr.bf16.mxu1 %v1080_v7 }
  0x1c   : > { %998 = vmatpush3.bf16.msra.mxu0 %v1080_v7  ;;  %1048 = vmatpush3.bf16.msra.mxu1 %v1080_v7 }
  0x1d   : > { %999 = vmatprep.subr.bf16.mxu0 %v1081_v8  ;;  %1041 = vmatprep.subr.bf16.mxu1 %v1081_v8 }
  0x20   : > { %1000 = vmatpush3.bf16.msra.mxu0 %v1081_v8  ;;  %1049 = vmatpush3.bf16.msra.mxu1 %v1081_v8 }
  0x21   : > { %1001 = vmatprep.subr.bf16.mxu0 %v1082_v9  ;;  %1042 = vmatprep.subr.bf16.mxu1 %v1082_v9 }
  0x24   : > { %1002 = vmatpush3.bf16.msra.mxu0 %v1082_v9  ;;  %1050 = vmatpush3.bf16.msra.mxu1 %v1082_v9 }
  0x27   : > { %1004 = vmatmul.mubr.bf16.vlgmr.msra.gmra.mrb[0].mxu0 %v1085_v10  ;;  %1020 = vmatmul.mubr.bf16.vlgmr.msra.gmra.mrb[0].mxu1 %v1086_v11 }
  0x28   : > { %1007 = vmatprep.mubr.bf16.mxu0 %v1087_v12  ;;  %1023 = vmatprep.mubr.bf16.mxu1 %v1088_v13 }
  0x2f   : > { %1008 = vmatmul.mubr.bf16.gmra.mrb[4].mxu0 %v1089_v14  ;;  %1024 = vmatmul.mubr.bf16.gmra.mrb[4].mxu1 %v1090_v15 }
  0x30   : > { %1011 = vmatprep.mubr.bf16.mxu0 %v1091_v16  ;;  %1027 = vmatprep.mubr.bf16.mxu1 %v1092_v17 }
  0x37   : > { %1012 = vmatmul.mubr.bf16.gmra.mrb[8].mxu0 %v1093_v18  ;;  %1028 = vmatmul.mubr.bf16.gmra.mrb[8].mxu1 %v1094_v19 }
  0x38   : > { %1015 = vmatprep.mubr.bf16.mxu0 %v1095_v20  ;;  %1031 = vmatprep.mubr.bf16.mxu1 %v1096_v21 }
  0x3f   : > { %1016 = vmatmul.mubr.bf16.gmra.mrb[12].mxu0 %v1097_v22  ;;  %1032 = vmatmul.mubr.bf16.gmra.mrb[12].mxu1 %v1098_v23 }
  0xfa   : > { %v1005_v25 = vpop.f32.mrb[0].mxu0  ;;  %v1021_v26 = vpop.f32.mrb[0].mxu1 }
  0xfb   : > { %v749_v27 = vadd.f32 %v1005_v25, %v1212_v24  ;;  %v765_v28 = vadd.f32 %v1021_v26, %v1212_v24  ;;  %v514_v29 = vpop.f32.mrb[1].mxu0  ;;  %v578_v30 = vpop.f32.mrb[1].mxu1 }
  0xfc   : > { %v747_v31 = vadd.f32 %v1212_v24, %v514_v29  ;;  %v763_v32 = vadd.f32 %v1212_v24, %v578_v30  ;;  %v1006_v33 = vpop.f32.mrb[2].mxu0  ;;  %v1022_v34 = vpop.f32.mrb[2].mxu1 }
  0xfd   : > { %v781_v35 = vmax.f32 %v749_v27, 0.0  ;;  %v797_v36 = vmax.f32 %v765_v28, 0.0  ;;  %v750_v37 = vadd.f32 %v1006_v33, %v1212_v24  ;;  %v766_v38 = vadd.f32 %v1022_v34, %v1212_v24  ;;  %v517_v39 = vpop.f32.mrb[3].mxu0  ;;  %v581_v40 = vpop.f32.mrb[3].mxu1 }
  0xfe   : > { %v779_v41 = vmax.f32 %v747_v31, 0.0  ;;  %v795_v42 = vmax.f32 %v763_v32, 0.0  ;;  %v748_v43 = vadd.f32 %v1212_v24, %v517_v39  ;;  %v764_v44 = vadd.f32 %v1212_v24, %v581_v40 }
  0xff   : > { %813 = vst [vmem:[%s1220_s19 + $0x10] sm:$0xff] %v781_v35  ;;  %829 = vst [vmem:[%s1220_s19 + $0x90] sm:$0xff] %v797_v36  ;;  %v782_v45 = vmax.f32 %v750_v37, 0.0  ;;  %v798_v46 = vmax.f32 %v766_v38, 0.0 }
 0x100   : > { %811 = vst [vmem:[%s1220_s19] sm:$0xff] %v779_v41  ;;  %827 = vst [vmem:[%s1220_s19 + $0x80] sm:$0xff] %v795_v42  ;;  %v780_v47 = vmax.f32 %v748_v43, 0.0  ;;  %v796_v48 = vmax.f32 %v764_v44, 0.0 }
 0x101   : > { %814 = vst [vmem:[%s1220_s19 + $0x18] sm:$0xff] %v782_v45  ;;  %830 = vst [vmem:[%s1220_s19 + $0x98] sm:$0xff] %v798_v46 }
 0x102   : > { %812 = vst [vmem:[%s1220_s19 + $0x8] sm:$0xff] %v780_v47  ;;  %828 = vst [vmem:[%s1220_s19 + $0x88] sm:$0xff] %v796_v48  ;;  %v1009_v49 = vpop.f32.mrb[4].mxu0  ;;  %v1025_v50 = vpop.f32.mrb[4].mxu1 }
 0x103   : > { %v753_v51 = vadd.f32 %v1009_v49, %v1212_v24  ;;  %v769_v52 = vadd.f32 %v1025_v50, %v1212_v24  ;;  %v530_v53 = vpop.f32.mrb[5].mxu0  ;;  %v594_v54 = vpop.f32.mrb[5].mxu1 }
 0x104   : > { %v751_v55 = vadd.f32 %v1212_v24, %v530_v53  ;;  %v767_v56 = vadd.f32 %v1212_v24, %v594_v54  ;;  %v1010_v57 = vpop.f32.mrb[6].mxu0  ;;  %v1026_v58 = vpop.f32.mrb[6].mxu1 }
 0x105   : > { %v785_v59 = vmax.f32 %v753_v51, 0.0  ;;  %v801_v60 = vmax.f32 %v769_v52, 0.0  ;;  %v754_v61 = vadd.f32 %v1010_v57, %v1212_v24  ;;  %v770_v62 = vadd.f32 %v1026_v58, %v1212_v24  ;;  %v533_v63 = vpop.f32.mrb[7].mxu0  ;;  %v597_v0 = vpop.f32.mrb[7].mxu1 }
 0x106   : > { %v783_v1 = vmax.f32 %v751_v55, 0.0  ;;  %v799_v2 = vmax.f32 %v767_v56, 0.0  ;;  %v752_v3 = vadd.f32 %v1212_v24, %v533_v63  ;;  %v768_v4 = vadd.f32 %v1212_v24, %v597_v0 }
 0x107   : > { %817 = vst [vmem:[%s1220_s19 + $0x30] sm:$0xff] %v785_v59  ;;  %833 = vst [vmem:[%s1220_s19 + $0xb0] sm:$0xff] %v801_v60  ;;  %v786_v5 = vmax.f32 %v754_v61, 0.0  ;;  %v802_v6 = vmax.f32 %v770_v62, 0.0 }
 0x108   : > { %815 = vst [vmem:[%s1220_s19 + $0x20] sm:$0xff] %v783_v1  ;;  %831 = vst [vmem:[%s1220_s19 + $0xa0] sm:$0xff] %v799_v2  ;;  %v784_v7 = vmax.f32 %v752_v3, 0.0  ;;  %v800_v8 = vmax.f32 %v768_v4, 0.0 }
 0x109   : > { %818 = vst [vmem:[%s1220_s19 + $0x38] sm:$0xff] %v786_v5  ;;  %834 = vst [vmem:[%s1220_s19 + $0xb8] sm:$0xff] %v802_v6 }
 0x10a   : > { %816 = vst [vmem:[%s1220_s19 + $0x28] sm:$0xff] %v784_v7  ;;  %832 = vst [vmem:[%s1220_s19 + $0xa8] sm:$0xff] %v800_v8  ;;  %v1013_v9 = vpop.f32.mrb[8].mxu0  ;;  %v1029_v10 = vpop.f32.mrb[8].mxu1 }
 0x10b   : > { %v757_v11 = vadd.f32 %v1013_v9, %v1212_v24  ;;  %v773_v12 = vadd.f32 %v1029_v10, %v1212_v24  ;;  %v546_v13 = vpop.f32.mrb[9].mxu0  ;;  %v610_v14 = vpop.f32.mrb[9].mxu1 }
 0x10c   : > { %v755_v15 = vadd.f32 %v1212_v24, %v546_v13  ;;  %v771_v16 = vadd.f32 %v1212_v24, %v610_v14  ;;  %v1014_v17 = vpop.f32.mrb[10].mxu0  ;;  %v1030_v18 = vpop.f32.mrb[10].mxu1 }
 0x10d   : > { %v789_v19 = vmax.f32 %v757_v11, 0.0  ;;  %v805_v20 = vmax.f32 %v773_v12, 0.0  ;;  %v758_v21 = vadd.f32 %v1014_v17, %v1212_v24  ;;  %v774_v22 = vadd.f32 %v1030_v18, %v1212_v24  ;;  %v549_v23 = vpop.f32.mrb[11].mxu0  ;;  %v613_v25 = vpop.f32.mrb[11].mxu1 }
 0x10e   : > { %v787_v26 = vmax.f32 %v755_v15, 0.0  ;;  %v803_v27 = vmax.f32 %v771_v16, 0.0  ;;  %v756_v28 = vadd.f32 %v1212_v24, %v549_v23  ;;  %v772_v29 = vadd.f32 %v1212_v24, %v613_v25 }
 0x10f   : > { %821 = vst [vmem:[%s1220_s19 + $0x50] sm:$0xff] %v789_v19  ;;  %837 = vst [vmem:[%s1220_s19 + $0xd0] sm:$0xff] %v805_v20  ;;  %v790_v30 = vmax.f32 %v758_v21, 0.0  ;;  %v806_v31 = vmax.f32 %v774_v22, 0.0 }
 0x110   : > { %819 = vst [vmem:[%s1220_s19 + $0x40] sm:$0xff] %v787_v26  ;;  %835 = vst [vmem:[%s1220_s19 + $0xc0] sm:$0xff] %v803_v27  ;;  %v788_v32 = vmax.f32 %v756_v28, 0.0  ;;  %v804_v33 = vmax.f32 %v772_v29, 0.0 }
 0x111   : > { %822 = vst [vmem:[%s1220_s19 + $0x58] sm:$0xff] %v790_v30  ;;  %838 = vst [vmem:[%s1220_s19 + $0xd8] sm:$0xff] %v806_v31 }
 0x112   : > { %820 = vst [vmem:[%s1220_s19 + $0x48] sm:$0xff] %v788_v32  ;;  %836 = vst [vmem:[%s1220_s19 + $0xc8] sm:$0xff] %v804_v33  ;;  %v1017_v34 = vpop.f32.mrb[12].mxu0  ;;  %v1033_v35 = vpop.f32.mrb[12].mxu1 }
 0x113   : > { %v761_v36 = vadd.f32 %v1017_v34, %v1212_v24  ;;  %v777_v37 = vadd.f32 %v1033_v35, %v1212_v24  ;;  %v562_v38 = vpop.f32.mrb[13].mxu0  ;;  %v626_v39 = vpop.f32.mrb[13].mxu1 }
 0x114   : > { %v759_v40 = vadd.f32 %v1212_v24, %v562_v38  ;;  %v775_v41 = vadd.f32 %v1212_v24, %v626_v39  ;;  %v1018_v42 = vpop.f32.mrb[14].mxu0  ;;  %v1034_v43 = vpop.f32.mrb[14].mxu1 }
 0x115   : > { %v793_v44 = vmax.f32 %v761_v36, 0.0  ;;  %v809_v45 = vmax.f32 %v777_v37, 0.0  ;;  %v762_v46 = vadd.f32 %v1018_v42, %v1212_v24  ;;  %v778_v47 = vadd.f32 %v1034_v43, %v1212_v24  ;;  %v565_v48 = vpop.f32.mrb[15].mxu0  ;;  %v629_v49 = vpop.f32.mrb[15].mxu1 }
 0x116   : > { %v791_v50 = vmax.f32 %v759_v40, 0.0  ;;  %v807_v51 = vmax.f32 %v775_v41, 0.0  ;;  %v760_v52 = vadd.f32 %v1212_v24, %v565_v48  ;;  %v776_v53 = vadd.f32 %v1212_v24, %v629_v49 }
 0x117   : > { %825 = vst [vmem:[%s1220_s19 + $0x70] sm:$0xff] %v793_v44  ;;  %841 = vst [vmem:[%s1220_s19 + $0xf0] sm:$0xff] %v809_v45  ;;  %v794_v54 = vmax.f32 %v762_v46, 0.0  ;;  %v810_v55 = vmax.f32 %v778_v47, 0.0 }
 0x118   : > { %823 = vst [vmem:[%s1220_s19 + $0x60] sm:$0xff] %v791_v50  ;;  %839 = vst [vmem:[%s1220_s19 + $0xe0] sm:$0xff] %v807_v51  ;;  %v792_v56 = vmax.f32 %v760_v52, 0.0  ;;  %v808_v57 = vmax.f32 %v776_v53, 0.0 }
 0x119   : > { %826 = vst [vmem:[%s1220_s19 + $0x78] sm:$0xff] %v794_v54  ;;  %842 = vst [vmem:[%s1220_s19 + $0xf8] sm:$0xff] %v810_v55 }
 0x11a   : > { %824 = vst [vmem:[%s1220_s19 + $0x68] sm:$0xff] %v792_v56  ;;  %840 = vst [vmem:[%s1220_s19 + $0xe8] sm:$0xff] %v808_v57 }
 0x11b PF: > { %s13_s14 = sadd.s32 1, %s1121_s14   ;;  %s1297_s12 = smov %s1117_s13 }
 0x11c   : > { %p10_p5 = scmp.ge.s32.totalorder %s13_s14, 4   ;;  %s1298_s13 = smov %s1300_s15 }
 0x11e   :  { %12 = sbr.rel (!%p10_p5) target bundleno = 2 (0x2), region = 73 }

// kernel: down_forward.5
= control target key start
LH: loop header
LB: loop body
LE: loop exit
PB: predicated region body
PF: predicated region fallthrough
CT: control target
= control target key end

     0   :  { %8 = vsyncpa [#allocation5], 0  ;;  %s1839_s0 = inlined_call_operand.vmem [shape: bf16[512,640], index: 0, kind: input, shape index: {}]   ;;  %s1840_s1 = inlined_call_operand.vmem [shape: bf16[640,128], index: 1, kind: input, shape index: {}]   ;;  %s1841_s2 = inlined_call_operand.vmem [shape: f32[1,128], index: 2, kind: input, shape index: {}]   ;;  %s1842_s3 = inlined_call_operand.hbm [shape: f32[512,128], index: 3, kind: output, shape index: {}]  }
   0x1   :  { %10 = vsyncpa [#allocation5 + $0x1], 0  ;;  %s1492_s12 = smov 0   ;;  %s1494_s13 = smov 0  }
   0x2   :  { %s1496_s14 = smov 0   ;;  %s1498_s15 = smov 0  }
   0x3   :  { %s1500_s16 = smov 0   ;;  %s1502_s17 = smov 0  }
   0x4   :  { %s1504_s18 = smov 0   ;;  %s1506_s19 = smov 0  }
   0x5   :  { %s1508_s20 = smov 0   ;;  %s1510_s21 = smov 0  }
   0x6 LB: > { %s1107_s22 = sadd.s32 4294967295, %s1466_s21   ;;  %s1108_s23 = sadd.s32 4294967294, %s1466_s21   ;;  %s1466_s21 = sphi %s1510_s21, %s16_s21   ;;  %s1462_s20 = sphi %s1508_s20, %s1854_s20   ;;  %s1458_s19 = sphi %s1506_s19, %s1853_s19   ;;  %s1454_s18 = sphi %s1504_s18, %s1852_s18   ;;  %s1450_s17 = sphi %s1502_s17, %s1851_s17   ;;  %s1446_s16 = sphi %s1500_s16, %s1850_s16   ;;  %s1442_s15 = sphi %s1498_s15, %s1849_s15   ;;  %s1438_s14 = sphi %s1496_s14, %s1848_s14   ;;  %s1434_s13 = sphi %s1494_s13, %s1847_s13   ;;  %s1430_s12 = sphi %s1492_s12, %s1846_s12  }
   0x7   : > { %s25_s24 = sadd.s32 1, %s1458_s19  ;;  %s28_s25 = sadd.s32 1, %s1462_s20 }
   0x8   : > { %p26_p0 = scmp.ge.s32.totalorder %s25_s24, 5  ;;  %s37_s26 = sadd.s32 1, %s1446_s16 }
   0x9   : > { %p44_p1 = scmp.ne.s32.totalorder %s1446_s16, %s1442_s15  ;;  %p45_p2 = scmp.eq.s32.totalorder %s1466_s21, 0 }
   0xa   : > { %s1856_s24 = smov (%p26_p0, %s25_s24), 0  ;;  %s1858_s25 = smov (!%p26_p0, %s28_s25), %s1462_s20 }
   0xb   : > { %s33_s27 = ssub.s32 %s1458_s19, %s1856_s24  ;;  %p1555_p3 = por %p45_p2, %p44_p1 }
   0xc   : > { %p30_p4 = scmp.ge.s32.totalorder %s1858_s25, 2  ;;  %s110_s29 = sadd.s32 1, %s1438_s14 }
   0xd   : > { %p120_p5 = scmp.ne.s32.totalorder %s1438_s14, %s1434_s13  ;;  %p121_p6 = scmp.eq.s32.totalorder %s1107_s22, 9 }
   0xe   : > { %s1860_s25 = smov (%p30_p4, %s1858_s25), 0  ;;  %p126_p8 = scmp.ne.s32.totalorder %s1434_s13, %s1430_s12 }
   0xf   : > { %p1564_p7 = por %p121_p6, %p120_p5  ;;  %s32_s4 = ssub.s32 %s1462_s20, %s1860_s25 }
  0x10   : > { %p127_p9 = scmp.eq.s32.totalorder %s1108_s23, 9  ;;  %s34_s5 = sor.u32 %s33_s27, %s32_s4 }
  0x11   : > { %p108_p10 = scmp.eq.s32.totalorder %s32_s4, 0  ;;  %p35_p11 = scmp.eq.s32.totalorder %s34_s5, 0 }
  0x12   : > { %p1572_p12 = por %p127_p9, %p126_p8  ;;  %p1110_p13 = scmp.ge.s32.totalorder %s1466_s21, 10 }
  0x13   : > { %s1577_s7 = scalar_select %p108_p10, %s1438_s14, %s110_s29  }
  0x14   : > { %s1580_s8 = scalar_select %p35_p11, %s1446_s16, %s37_s26  }
  0x15   : > { %146 = sbr.rel (%p1110_p13) target bundleno = 56 (0x38), region = 20 }
  0x1c   : > { %149 = sbr.rel (!%p1555_p3) target bundleno = 56 (0x38), region = 24  ;;  %s151_s9 = sand.u32 (%p1555_p3), 1, %s1446_s16  }
  0x1d   : > { %s1241_s10 = smul.u32 (%p1555_p3), 160, %s1462_s20  ;;  %s1111_s11 = sshll.u32 (%p1555_p3), %s151_s9, 7 }
  0x1e   : > { %s1596_s26 = scalar_lea.vmem (%p1555_p3), [#allocation3], %s1111_s11 }
  0x1f   : > { %s156_s22 = sadd.s32 (%p1555_p3), %s1458_s19, %s1241_s10 }
  0x20   : > { %s1114_s23 = sshll.u32 (%p1555_p3), %s156_s22, 2 }
  0x21   : > { %s1591_s29 = scalar_lea.vmem (%p1555_p3), %s1839_s0, %s1114_s23 }
  0x22   : > { %v174_v0 = vld [vmem:[%s1591_s29] sm:$0xf] (%p1555_p3)  ;;  %v176_v1 = vld [vmem:[%s1591_s29 + $0x14] sm:$0xf] (%p1555_p3)  ;;  %v178_v2 = vld [vmem:[%s1591_s29 + $0x28] sm:$0xf] (%p1555_p3) }
  0x23   : > { %175 = vst [vmem:[%s1596_s26] sm:$0xf] %v174_v0  ;;  %177 = vst [vmem:[%s1596_s26 + $0x4] sm:$0xf] %v176_v1  ;;  %v180_v3 = vld [vmem:[%s1591_s29 + $0x3c] sm:$0xf] }
  0x24   : > { %179 = vst [vmem:[%s1596_s26 + $0x8] sm:$0xf] %v178_v2  ;;  %v182_v4 = vld [vmem:[%s1591_s29 + $0x50] sm:$0xf]  ;;  %v184_v5 = vld [vmem:[%s1591_s29 + $0x64] sm:$0xf] }
  0x25   : > { %181 = vst [vmem:[%s1596_s26 + $0xc] sm:$0xf] %v180_v3  ;;  %183 = vst [vmem:[%s1596_s26 + $0x10] sm:$0xf] %v182_v4  ;;  %v186_v6 = vld [vmem:[%s1591_s29 + $0x78] sm:$0xf] }
  0x26   : > { %185 = vst [vmem:[%s1596_s26 + $0x14] sm:$0xf] %v184_v5  ;;  %v188_v7 = vld [vmem:[%s1591_s29 + $0x8c] sm:$0xf]  ;;  %v190_v8 = vld [vmem:[%s1591_s29 + $0xa0] sm:$0xf] }
  0x27   : > { %187 = vst [vmem:[%s1596_s26 + $0x18] sm:$0xf] %v186_v6  ;;  %189 = vst [vmem:[%s1596_s26 + $0x1c] sm:$0xf] %v188_v7  ;;  %v192_v9 = vld [vmem:[%s1591_s29 + $0xb4] sm:$0xf] }
  0x28   : > { %191 = vst [vmem:[%s1596_s26 + $0x20] sm:$0xf] %v190_v8  ;;  %v194_v10 = vld [vmem:[%s1591_s29 + $0xc8] sm:$0xf]  ;;  %v196_v11 = vld [vmem:[%s1591_s29 + $0xdc] sm:$0xf] }
  0x29   : > { %193 = vst [vmem:[%s1596_s26 + $0x24] sm:$0xf] %v192_v9  ;;  %195 = vst [vmem:[%s1596_s26 + $0x28] sm:$0xf] %v194_v10  ;;  %v198_v12 = vld [vmem:[%s1591_s29 + $0xf0] sm:$0xf] }
  0x2a   : > { %197 = vst [vmem:[%s1596_s26 + $0x2c] sm:$0xf] %v196_v11  ;;  %v200_v13 = vld [vmem:[%s1591_s29 + $0x104] sm:$0xf]  ;;  %v202_v14 = vld [vmem:[%s1591_s29 + $0x118] sm:$0xf] }
  0x2b   : > { %199 = vst [vmem:[%s1596_s26 + $0x30] sm:$0xf] %v198_v12  ;;  %201 = vst [vmem:[%s1596_s26 + $0x34] sm:$0xf] %v200_v13  ;;  %v204_v15 = vld [vmem:[%s1591_s29 + $0x12c] sm:$0xf] }
  0x2c   : > { %203 = vst [vmem:[%s1596_s26 + $0x38] sm:$0xf] %v202_v14  ;;  %v206_v16 = vld [vmem:[%s1591_s29 + $0x140] sm:$0xf]  ;;  %v208_v17 = vld [vmem:[%s1591_s29 + $0x154] sm:$0xf] }
  0x2d   : > { %205 = vst [vmem:[%s1596_s26 + $0x3c] sm:$0xf] %v204_v15  ;;  %207 = vst [vmem:[%s1596_s26 + $0x40] sm:$0xf] %v206_v16  ;;  %v210_v18 = vld [vmem:[%s1591_s29 + $0x168] sm:$0xf] }
  0x2e   : > { %209 = vst [vmem:[%s1596_s26 + $0x44] sm:$0xf] %v208_v17  ;;  %v212_v19 = vld [vmem:[%s1591_s29 + $0x17c] sm:$0xf]  ;;  %v214_v20 = vld [vmem:[%s1591_s29 + $0x190] sm:$0xf] }
  0x2f   : > { %211 = vst [vmem:[%s1596_s26 + $0x48] sm:$0xf] %v210_v18  ;;  %213 = vst [vmem:[%s1596_s26 + $0x4c] sm:$0xf] %v212_v19  ;;  %v216_v21 = vld [vmem:[%s1591_s29 + $0x1a4] sm:$0xf] }
  0x30   : > { %215 = vst [vmem:[%s1596_s26 + $0x50] sm:$0xf] %v214_v20  ;;  %v218_v22 = vld [vmem:[%s1591_s29 + $0x1b8] sm:$0xf]  ;;  %v220_v23 = vld [vmem:[%s1591_s29 + $0x1cc] sm:$0xf] }
  0x31   : > { %217 = vst [vmem:[%s1596_s26 + $0x54] sm:$0xf] %v216_v21  ;;  %219 = vst [vmem:[%s1596_s26 + $0x58] sm:$0xf] %v218_v22  ;;  %v222_v24 = vld [vmem:[%s1591_s29 + $0x1e0] sm:$0xf] }
  0x32   : > { %221 = vst [vmem:[%s1596_s26 + $0x5c] sm:$0xf] %v220_v23  ;;  %v224_v25 = vld [vmem:[%s1591_s29 + $0x1f4] sm:$0xf]  ;;  %v226_v26 = vld [vmem:[%s1591_s29 + $0x208] sm:$0xf] }
  0x33   : > { %223 = vst [vmem:[%s1596_s26 + $0x60] sm:$0xf] %v222_v24  ;;  %225 = vst [vmem:[%s1596_s26 + $0x64] sm:$0xf] %v224_v25  ;;  %v228_v27 = vld [vmem:[%s1591_s29 + $0x21c] sm:$0xf] }
  0x34   : > { %227 = vst [vmem:[%s1596_s26 + $0x68] sm:$0xf] %v226_v26  ;;  %v230_v28 = vld [vmem:[%s1591_s29 + $0x230] sm:$0xf]  ;;  %v232_v29 = vld [vmem:[%s1591_s29 + $0x244] sm:$0xf] }
  0x35   : > { %229 = vst [vmem:[%s1596_s26 + $0x6c] sm:$0xf] %v228_v27  ;;  %231 = vst [vmem:[%s1596_s26 + $0x70] sm:$0xf] %v230_v28  ;;  %v234_v30 = vld [vmem:[%s1591_s29 + $0x258] sm:$0xf] }
  0x36   : > { %233 = vst [vmem:[%s1596_s26 + $0x74] sm:$0xf] %v232_v29  ;;  %v236_v31 = vld [vmem:[%s1591_s29 + $0x26c] sm:$0xf]  ;;  %235 = vst [vmem:[%s1596_s26 + $0x78] sm:$0xf] %v234_v30 }
  0x37   : > { %237 = vst [vmem:[%s1596_s26 + $0x7c] sm:$0xf] %v236_v31 }
  0x38 PF: > { %p1115_p0 = scmp.ge.s32.totalorder %s1466_s21, 1  ;;  %p332_p1 = scmp.lt.s32.totalorder %s1466_s21, 11 }
  0x3a   : > { %p333_p2 = pnand %p1115_p0, %p332_p1 }
  0x3b   : > { %s339_s28 = sand.u32 (!%p333_p2), 1, %s1442_s15   ;;  %s364_s5 = sand.u32 (!%p333_p2), 1, %s1434_s13  }
  0x3c   : > { %336 = sbr.rel (%p333_p2) target bundleno = 398 (0x18e), region = 69  ;;  %s1116_s9 = sshll.u32 (!%p333_p2), %s339_s28, 7 }
  0x3d   : > { %s1117_s10 = sshll.u32 (!%p333_p2), %s364_s5, 8  ;;  %s1118_s11 = sshll.u32 (!%p333_p2), %s1450_s17, 4 }
  0x3e   : > { %p369_p3 = scmp.lt.s32.totalorder (!%p333_p2), %s1118_s11, 79  ;;  %s1671_s29 = scalar_lea.vmem (!%p333_p2), [#allocation3], %s1116_s9 }
  0x3f   : > { %s1673_s26 = scalar_lea.vmem (!%p333_p2), [#allocation4], %s1117_s10  ;;  %p1120_p4 = scmp.ne.s32.totalorder (!%p333_p2), %s1450_s17, 0 }
  0x43   : > { %s1862_s11 = smov (!%p369_p3, %s1118_s11), 79  ;;  %379 = sbr.rel (%p1120_p4) target bundleno = 85 (0x55), region = 77 }
  0x44   : > { %s1119_s22 = sshll.u32 %s1862_s11, 2  ;;  %v1468_v32 = vmov (!%p1120_p4), 0.0  }
  0x45   : > { %s1669_s4 = scalar_lea.vmem %s1840_s1, %s1119_s22  ;;  %380 = vst [vmem:[#allocation2] sm:$0xff] (!%p1120_p4), %v1468_v32  ;;  %381 = vst [vmem:[#allocation2 + $0x8] sm:$0xff] (!%p1120_p4), %v1468_v32 }
  0x46   : > { %382 = vst [vmem:[#allocation2 + $0x10] sm:$0xff] (!%p1120_p4), %v1468_v32  ;;  %383 = vst [vmem:[#allocation2 + $0x18] sm:$0xff] (!%p1120_p4), %v1468_v32 }
  0x47   : > { %384 = vst [vmem:[#allocation2 + $0x20] sm:$0xff] (!%p1120_p4), %v1468_v32  ;;  %385 = vst [vmem:[#allocation2 + $0x28] sm:$0xff] (!%p1120_p4), %v1468_v32 }
  0x48   : > { %386 = vst [vmem:[#allocation2 + $0x30] sm:$0xff] (!%p1120_p4), %v1468_v32  ;;  %387 = vst [vmem:[#allocation2 + $0x38] sm:$0xff] (!%p1120_p4), %v1468_v32 }
  0x49   : > { %388 = vst [vmem:[#allocation2 + $0x40] sm:$0xff] (!%p1120_p4), %v1468_v32  ;;  %389 = vst [vmem:[#allocation2 + $0x48] sm:$0xff] (!%p1120_p4), %v1468_v32 }
  0x4a   : > { %390 = vst [vmem:[#allocation2 + $0x50] sm:$0xff] %v1468_v32  ;;  %391 = vst [vmem:[#allocation2 + $0x58] sm:$0xff] %v1468_v32 }
  0x4b   : > { %392 = vst [vmem:[#allocation2 + $0x60] sm:$0xff] %v1468_v32  ;;  %393 = vst [vmem:[#allocation2 + $0x68] sm:$0xff] %v1468_v32 }
  0x4c   : > { %394 = vst [vmem:[#allocation2 + $0x70] sm:$0xff] %v1468_v32  ;;  %395 = vst [vmem:[#allocation2 + $0x78] sm:$0xff] %v1468_v32 }
  0x4d   : > { %396 = vst [vmem:[#allocation2 + $0x80] sm:$0xff] %v1468_v32  ;;  %397 = vst [vmem:[#allocation2 + $0x88] sm:$0xff] %v1468_v32 }
  0x4e   : > { %398 = vst [vmem:[#allocation2 + $0x90] sm:$0xff] %v1468_v32  ;;  %399 = vst [vmem:[#allocation2 + $0x98] sm:$0xff] %v1468_v32 }
  0x4f   : > { %400 = vst [vmem:[#allocation2 + $0xa0] sm:$0xff] %v1468_v32  ;;  %401 = vst [vmem:[#allocation2 + $0xa8] sm:$0xff] %v1468_v32 }
  0x50   : > { %402 = vst [vmem:[#allocation2 + $0xb0] sm:$0xff] %v1468_v32  ;;  %403 = vst [vmem:[#allocation2 + $0xb8] sm:$0xff] %v1468_v32 }
  0x51   : > { %404 = vst [vmem:[#allocation2 + $0xc0] sm:$0xff] %v1468_v32  ;;  %405 = vst [vmem:[#allocation2 + $0xc8] sm:$0xff] %v1468_v32 }
  0x52   : > { %406 = vst [vmem:[#allocation2 + $0xd0] sm:$0xff] %v1468_v32  ;;  %407 = vst [vmem:[#allocation2 + $0xd8] sm:$0xff] %v1468_v32 }
  0x53   : > { %408 = vst [vmem:[#allocation2 + $0xe0] sm:$0xff] %v1468_v32  ;;  %409 = vst [vmem:[#allocation2 + $0xe8] sm:$0xff] %v1468_v32 }
  0x54   : > { %410 = vst [vmem:[#allocation2 + $0xf0] sm:$0xff] %v1468_v32  ;;  %411 = vst [vmem:[#allocation2 + $0xf8] sm:$0xff] %v1468_v32 }
  0x55 PF: > { %v1332_v33 = vld [vmem:[%s1669_s4] sm:$0xff]   ;;  %v1333_v34 = vld [vmem:[%s1669_s4 + $0x8] sm:$0xff]   ;;  %v1334_v35 = vld [vmem:[%s1669_s4 + $0x10] sm:$0xff]   ;;  %p1145_p5 = scmp.ne.s32.totalorder %s1450_s17, 4 }
  0x56   : > { %1177 = vmatprep.subr.bf16.mxu0 %v1332_v33  ;;  %1225 = vmatprep.subr.bf16.mxu1 %v1332_v33  ;;  %v1335_v36 = vld [vmem:[%s1669_s4 + $0x18] sm:$0xff]   ;;  %v1340_v37 = vld [vmem:[%s1671_s29] sm:$0xff]   ;;  %v1337_v40 = vld [vmem:[%s1669_s4 + $0x28] sm:$0xff]  }
  0x57   : > { %1178 = vmatpush3.bf16.msra.mxu0 %v1332_v33  ;;  %1233 = vmatpush3.bf16.msra.mxu1 %v1332_v33  ;;  %v1341_v38 = vld [vmem:[%s1671_s29 + $0x40] sm:$0xff]   ;;  %v1338_v41 = vld [vmem:[%s1669_s4 + $0x30] sm:$0xff]   ;;  %v1339_v42 = vld [vmem:[%s1669_s4 + $0x38] sm:$0xff]  }
  0x58   : > { %1179 = vmatprep.subr.bf16.mxu0 %v1333_v34  ;;  %1226 = vmatprep.subr.bf16.mxu1 %v1333_v34  ;;  %v1336_v39 = vld [vmem:[%s1669_s4 + $0x20] sm:$0xff]   ;;  %v1342_v43 = vld [vmem:[%s1671_s29 + $0x8] sm:$0xff]   ;;  %v1344_v45 = vld [vmem:[%s1671_s29 + $0x10] sm:$0xff]  }
  0x59   : > { %1193 = vmatprep.mubr.bf16.mxu0 %v1340_v37  ;;  %1209 = vmatprep.mubr.bf16.mxu1 %v1341_v38  ;;  %v1343_v44 = vld [vmem:[%s1671_s29 + $0x48] sm:$0xff]   ;;  %v1345_v46 = vld [vmem:[%s1671_s29 + $0x50] sm:$0xff]   ;;  %v1346_v47 = vld [vmem:[%s1671_s29 + $0x18] sm:$0xff]  }
  0x5a   : > { %v1347_v48 = vld [vmem:[%s1671_s29 + $0x58] sm:$0xff]   ;;  %v1348_v49 = vld [vmem:[%s1671_s29 + $0x20] sm:$0xff]   ;;  %v1350_v51 = vld [vmem:[%s1671_s29 + $0x28] sm:$0xff]  }
  0x5b   : > { %1180 = vmatpush3.bf16.msra.mxu0 %v1333_v34  ;;  %1234 = vmatpush3.bf16.msra.mxu1 %v1333_v34  ;;  %v1349_v50 = vld [vmem:[%s1671_s29 + $0x60] sm:$0xff]   ;;  %v1351_v52 = vld [vmem:[%s1671_s29 + $0x68] sm:$0xff]   ;;  %v1352_v53 = vld [vmem:[%s1671_s29 + $0x30] sm:$0xff]  }
  0x5c   : > { %1181 = vmatprep.subr.bf16.mxu0 %v1334_v35  ;;  %1227 = vmatprep.subr.bf16.mxu1 %v1334_v35  ;;  %v1353_v54 = vld [vmem:[%s1671_s29 + $0x70] sm:$0xff]   ;;  %v1354_v55 = vld [vmem:[%s1671_s29 + $0x38] sm:$0xff]   ;;  %v412_v59 = vld [vmem:[#allocation2] sm:$0xff] }
  0x5d   : > { %v1355_v56 = vld [vmem:[%s1671_s29 + $0x78] sm:$0xff]   ;;  %v414_v57 = vld [vmem:[#allocation2 + $0x10] sm:$0xff]  ;;  %v428_v60 = vld [vmem:[#allocation2 + $0x80] sm:$0xff] }
  0x5e   : > { %v430_v58 = vld [vmem:[#allocation2 + $0x90] sm:$0xff]  ;;  %v415_v63 = vld [vmem:[#allocation2 + $0x18] sm:$0xff]  ;;  %v413_v5 = vld [vmem:[#allocation2 + $0x8] sm:$0xff] }
  0x5f   : > { %1182 = vmatpush3.bf16.msra.mxu0 %v1334_v35  ;;  %1235 = vmatpush3.bf16.msra.mxu1 %v1334_v35  ;;  %v431_v0 = vld [vmem:[#allocation2 + $0x98] sm:$0xff]  ;;  %v429_v6 = vld [vmem:[#allocation2 + $0x88] sm:$0xff]  ;;  %v418_v17 = vld [vmem:[#allocation2 + $0x30] sm:$0xff] }
  0x60   : > { %1183 = vmatprep.subr.bf16.mxu0 %v1335_v36  ;;  %1228 = vmatprep.subr.bf16.mxu1 %v1335_v36  ;;  %v434_v18 = vld [vmem:[#allocation2 + $0xb0] sm:$0xff]  ;;  %v416_v19 = vld [vmem:[#allocation2 + $0x20] sm:$0xff]  ;;  %v419_v23 = vld [vmem:[#allocation2 + $0x38] sm:$0xff] }
  0x61   : > { %v432_v20 = vld [vmem:[#allocation2 + $0xa0] sm:$0xff]  ;;  %v435_v24 = vld [vmem:[#allocation2 + $0xb8] sm:$0xff]  ;;  %v417_v29 = vld [vmem:[#allocation2 + $0x28] sm:$0xff] }
  0x62   : > { %v433_v30 = vld [vmem:[#allocation2 + $0xa8] sm:$0xff] }
  0x63   : > { %1184 = vmatpush3.bf16.msra.mxu0 %v1335_v36  ;;  %1236 = vmatpush3.bf16.msra.mxu1 %v1335_v36 }
  0x64   : > { %1185 = vmatprep.subr.bf16.mxu0 %v1336_v39  ;;  %1229 = vmatprep.subr.bf16.mxu1 %v1336_v39 }
  0x67   : > { %1186 = vmatpush3.bf16.msra.mxu0 %v1336_v39  ;;  %1237 = vmatpush3.bf16.msra.mxu1 %v1336_v39 }
  0x68   : > { %1187 = vmatprep.subr.bf16.mxu0 %v1337_v40  ;;  %1230 = vmatprep.subr.bf16.mxu1 %v1337_v40 }
  0x6b   : > { %1188 = vmatpush3.bf16.msra.mxu0 %v1337_v40  ;;  %1238 = vmatpush3.bf16.msra.mxu1 %v1337_v40 }
  0x6c   : > { %1189 = vmatprep.subr.bf16.mxu0 %v1338_v41  ;;  %1231 = vmatprep.subr.bf16.mxu1 %v1338_v41 }
  0x6f   : > { %1190 = vmatpush3.bf16.msra.mxu0 %v1338_v41  ;;  %1239 = vmatpush3.bf16.msra.mxu1 %v1338_v41  ;;  %v422_v41 = vld [vmem:[#allocation2 + $0x50] sm:$0xff] }
  0x70   : > { %1191 = vmatprep.subr.bf16.mxu0 %v1339_v42  ;;  %1232 = vmatprep.subr.bf16.mxu1 %v1339_v42 }
  0x73   : > { %1192 = vmatpush3.bf16.msra.mxu0 %v1339_v42  ;;  %1240 = vmatpush3.bf16.msra.mxu1 %v1339_v42  ;;  %v438_v42 = vld [vmem:[#allocation2 + $0xd0] sm:$0xff] }
  0x76   : > { %1194 = vmatmul.mubr.bf16.vlgmr.msra.gmra.mrb[0].mxu0 %v1342_v43  ;;  %1210 = vmatmul.mubr.bf16.vlgmr.msra.gmra.mrb[0].mxu1 %v1343_v44  ;;  %v420_v43 = vld [vmem:[#allocation2 + $0x40] sm:$0xff] }
  0x77   : > { %1197 = vmatprep.mubr.bf16.mxu0 %v1344_v45  ;;  %1213 = vmatprep.mubr.bf16.mxu1 %v1345_v46  ;;  %v436_v44 = vld [vmem:[#allocation2 + $0xc0] sm:$0xff] }
  0x7e   : > { %1198 = vmatmul.mubr.bf16.gmra.mrb[4].mxu0 %v1346_v47  ;;  %1214 = vmatmul.mubr.bf16.gmra.mrb[4].mxu1 %v1347_v48  ;;  %v423_v47 = vld [vmem:[#allocation2 + $0x58] sm:$0xff] }
  0x7f   : > { %1201 = vmatprep.mubr.bf16.mxu0 %v1348_v49  ;;  %1217 = vmatprep.mubr.bf16.mxu1 %v1349_v50  ;;  %v439_v48 = vld [vmem:[#allocation2 + $0xd8] sm:$0xff] }
  0x86   : > { %1202 = vmatmul.mubr.bf16.gmra.mrb[8].mxu0 %v1350_v51  ;;  %1218 = vmatmul.mubr.bf16.gmra.mrb[8].mxu1 %v1351_v52 }
  0x87   : > { %1205 = vmatprep.mubr.bf16.mxu0 %v1352_v53  ;;  %1221 = vmatprep.mubr.bf16.mxu1 %v1353_v54  ;;  %v421_v53 = vld [vmem:[#allocation2 + $0x48] sm:$0xff] }
  0x88   : > { %v437_v54 = vld [vmem:[#allocation2 + $0xc8] sm:$0xff] }
  0x8e   : > { %1206 = vmatmul.mubr.bf16.gmra.mrb[12].mxu0 %v1354_v55  ;;  %1222 = vmatmul.mubr.bf16.gmra.mrb[12].mxu1 %v1355_v56 }
 0x149   : > { %v1195_v61 = vpop.f32.mrb[0].mxu0  ;;  %v1211_v62 = vpop.f32.mrb[0].mxu1 }
 0x14a   : > { %v799_v1 = vadd.f32 %v1195_v61, %v414_v57  ;;  %v815_v2 = vadd.f32 %v1211_v62, %v430_v58  ;;  %v670_v3 = vpop.f32.mrb[1].mxu0  ;;  %v734_v4 = vpop.f32.mrb[1].mxu1 }
 0x14b   : > { %v797_v7 = vadd.f32 %v670_v3, %v412_v59  ;;  %v813_v8 = vadd.f32 %v734_v4, %v428_v60  ;;  %v1196_v9 = vpop.f32.mrb[2].mxu0  ;;  %v1212_v10 = vpop.f32.mrb[2].mxu1  ;;  %v424_v3 = vld [vmem:[#allocation2 + $0x60] sm:$0xff] }
 0x14c   : > { %831 = vst [vmem:[#allocation2 + $0x10] sm:$0xff] %v799_v1  ;;  %847 = vst [vmem:[#allocation2 + $0x90] sm:$0xff] %v815_v2  ;;  %v800_v11 = vadd.f32 %v1196_v9, %v415_v63  ;;  %v816_v12 = vadd.f32 %v1212_v10, %v431_v0  ;;  %v673_v13 = vpop.f32.mrb[3].mxu0  ;;  %v737_v14 = vpop.f32.mrb[3].mxu1  ;;  %v426_v1 = vld [vmem:[#allocation2 + $0x70] sm:$0xff]  ;;  %v440_v4 = vld [vmem:[#allocation2 + $0xe0] sm:$0xff] }
 0x14d   : > { %829 = vst [vmem:[#allocation2] sm:$0xff] %v797_v7  ;;  %845 = vst [vmem:[#allocation2 + $0x80] sm:$0xff] %v813_v8  ;;  %v798_v15 = vadd.f32 %v673_v13, %v413_v5  ;;  %v814_v16 = vadd.f32 %v737_v14, %v429_v6  ;;  %v442_v2 = vld [vmem:[#allocation2 + $0xf0] sm:$0xff]  ;;  %v427_v7 = vld [vmem:[#allocation2 + $0x78] sm:$0xff] }
 0x14e   : > { %832 = vst [vmem:[#allocation2 + $0x18] sm:$0xff] %v800_v11  ;;  %848 = vst [vmem:[#allocation2 + $0x98] sm:$0xff] %v816_v12  ;;  %v443_v8 = vld [vmem:[#allocation2 + $0xf8] sm:$0xff]  ;;  %v425_v13 = vld [vmem:[#allocation2 + $0x68] sm:$0xff] }
 0x14f   : > { %830 = vst [vmem:[#allocation2 + $0x8] sm:$0xff] %v798_v15  ;;  %846 = vst [vmem:[#allocation2 + $0x88] sm:$0xff] %v814_v16  ;;  %v441_v14 = vld [vmem:[#allocation2 + $0xe8] sm:$0xff] }
 0x151   : > { %v1199_v21 = vpop.f32.mrb[4].mxu0  ;;  %v1215_v22 = vpop.f32.mrb[4].mxu1 }
 0x152   : > { %v803_v25 = vadd.f32 %v1199_v21, %v418_v17  ;;  %v819_v26 = vadd.f32 %v1215_v22, %v434_v18  ;;  %v686_v27 = vpop.f32.mrb[5].mxu0  ;;  %v750_v28 = vpop.f32.mrb[5].mxu1 }
 0x153   : > { %v801_v31 = vadd.f32 %v686_v27, %v416_v19  ;;  %v817_v32 = vadd.f32 %v750_v28, %v432_v20  ;;  %v1200_v33 = vpop.f32.mrb[6].mxu0  ;;  %v1216_v34 = vpop.f32.mrb[6].mxu1 }
 0x154   : > { %835 = vst [vmem:[#allocation2 + $0x30] sm:$0xff] %v803_v25  ;;  %851 = vst [vmem:[#allocation2 + $0xb0] sm:$0xff] %v819_v26  ;;  %v804_v35 = vadd.f32 %v1200_v33, %v419_v23  ;;  %v820_v36 = vadd.f32 %v1216_v34, %v435_v24  ;;  %v689_v37 = vpop.f32.mrb[7].mxu0  ;;  %v753_v38 = vpop.f32.mrb[7].mxu1  ;;  %v865_v25 = vld [vmem:[#allocation2] sm:$0xff] (!%p1145_p5) }
 0x155   : > { %833 = vst [vmem:[#allocation2 + $0x20] sm:$0xff] %v801_v31  ;;  %849 = vst [vmem:[#allocation2 + $0xa0] sm:$0xff] %v817_v32  ;;  %v802_v39 = vadd.f32 %v689_v37, %v417_v29  ;;  %v818_v40 = vadd.f32 %v753_v38, %v433_v30  ;;  %v1704_v26 = vld [vmem:[%s1841_s2] ss:$0 sm:$0xff] (!%p1145_p5)  ;;  %v867_v30 = vld [vmem:[#allocation2 + $0x10] sm:$0xff] (!%p1145_p5) }
 0x156   : > { %836 = vst [vmem:[#allocation2 + $0x38] sm:$0xff] %v804_v35  ;;  %852 = vst [vmem:[#allocation2 + $0xb8] sm:$0xff] %v820_v36  ;;  %v866_v27 = vld [vmem:[#allocation2 + $0x8] sm:$0xff] (!%p1145_p5)  ;;  %v904_v28 = vadd.f32 (!%p1145_p5), %v1704_v26, %v865_v25  ;;  %v868_v31 = vld [vmem:[#allocation2 + $0x18] sm:$0xff] (!%p1145_p5)  ;;  %v906_v33 = vadd.f32 (!%p1145_p5), %v1704_v26, %v867_v30 }
 0x157   : > { %834 = vst [vmem:[#allocation2 + $0x28] sm:$0xff] %v802_v39  ;;  %850 = vst [vmem:[#allocation2 + $0xa8] sm:$0xff] %v818_v40  ;;  %v905_v29 = vadd.f32 (!%p1145_p5), %v1704_v26, %v866_v27  ;;  %v907_v34 = vadd.f32 (!%p1145_p5), %v1704_v26, %v868_v31 }
 0x158   : > { %v936_v39 = vmax.f32 (!%p1145_p5), %v904_v28, 0.0 }
 0x159   : > { %v1203_v45 = vpop.f32.mrb[8].mxu0  ;;  %v1219_v46 = vpop.f32.mrb[8].mxu1  ;;  %v937_v40 = vmax.f32 (!%p1145_p5), %v905_v29, 0.0 }
 0x15a   : > { %v807_v49 = vadd.f32 %v1203_v45, %v422_v41  ;;  %v823_v50 = vadd.f32 %v1219_v46, %v438_v42  ;;  %v702_v51 = vpop.f32.mrb[9].mxu0  ;;  %v766_v52 = vpop.f32.mrb[9].mxu1  ;;  %v938_v46 = vmax.f32 (!%p1145_p5), %v906_v33, 0.0  ;;  %968 = vst [vmem:[%s1673_s26] sm:$0xff] (!%p1145_p5), %v936_v39 }
 0x15b   : > { %v805_v55 = vadd.f32 %v702_v51, %v420_v43  ;;  %v821_v56 = vadd.f32 %v766_v52, %v436_v44  ;;  %v1204_v57 = vpop.f32.mrb[10].mxu0  ;;  %v1220_v58 = vpop.f32.mrb[10].mxu1  ;;  %v871_v37 = vld [vmem:[#allocation2 + $0x30] sm:$0xff] (!%p1145_p5)  ;;  %969 = vst [vmem:[%s1673_s26 + $0x8] sm:$0xff] (!%p1145_p5), %v937_v40 }
 0x15c   : > { %839 = vst [vmem:[#allocation2 + $0x50] sm:$0xff] %v807_v49  ;;  %855 = vst [vmem:[#allocation2 + $0xd0] sm:$0xff] %v823_v50  ;;  %v808_v59 = vadd.f32 %v1204_v57, %v423_v47  ;;  %v824_v60 = vadd.f32 %v1220_v58, %v439_v48  ;;  %v705_v61 = vpop.f32.mrb[11].mxu0  ;;  %v769_v62 = vpop.f32.mrb[11].mxu1  ;;  %v869_v32 = vld [vmem:[#allocation2 + $0x20] sm:$0xff] (!%p1145_p5)  ;;  %v910_v42 = vadd.f32 (!%p1145_p5), %v1704_v26, %v871_v37  ;;  %v939_v47 = vmax.f32 (!%p1145_p5), %v907_v34, 0.0 }
 0x15d   : > { %837 = vst [vmem:[#allocation2 + $0x40] sm:$0xff] %v805_v55  ;;  %853 = vst [vmem:[#allocation2 + $0xc0] sm:$0xff] %v821_v56  ;;  %v806_v63 = vadd.f32 %v705_v61, %v421_v53  ;;  %v822_v0 = vadd.f32 %v769_v62, %v437_v54  ;;  %v908_v35 = vadd.f32 (!%p1145_p5), %v1704_v26, %v869_v32  ;;  %v872_v38 = vld [vmem:[#allocation2 + $0x38] sm:$0xff] (!%p1145_p5) }
 0x15e   : > { %840 = vst [vmem:[#allocation2 + $0x58] sm:$0xff] %v808_v59  ;;  %856 = vst [vmem:[#allocation2 + $0xd8] sm:$0xff] %v824_v60  ;;  %v870_v36 = vld [vmem:[#allocation2 + $0x28] sm:$0xff] (!%p1145_p5)  ;;  %v911_v49 = vadd.f32 (!%p1145_p5), %v1704_v26, %v872_v38  ;;  %v942_v54 = vmax.f32 (!%p1145_p5), %v910_v42, 0.0 }
 0x15f   : > { %838 = vst [vmem:[#allocation2 + $0x48] sm:$0xff] %v806_v63  ;;  %854 = vst [vmem:[#allocation2 + $0xc8] sm:$0xff] %v822_v0  ;;  %v909_v41 = vadd.f32 (!%p1145_p5), %v1704_v26, %v870_v36  ;;  %v940_v48 = vmax.f32 (!%p1145_p5), %v908_v35, 0.0  ;;  %v881_v63 = vld [vmem:[#allocation2 + $0x80] sm:$0xff] (!%p1145_p5)  ;;  %v882_v0 = vld [vmem:[#allocation2 + $0x88] sm:$0xff] (!%p1145_p5) }
 0x160   : > { %970 = vst [vmem:[%s1673_s26 + $0x10] sm:$0xff] (!%p1145_p5), %v938_v46  ;;  %971 = vst [vmem:[%s1673_s26 + $0x18] sm:$0xff] (!%p1145_p5), %v939_v47  ;;  %v943_v59 = vmax.f32 (!%p1145_p5), %v911_v49, 0.0 }
 0x161   : > { %v1207_v5 = vpop.f32.mrb[12].mxu0  ;;  %v1223_v6 = vpop.f32.mrb[12].mxu1  ;;  %864 = sbr.rel (%p1145_p5) target bundleno = 373 (0x175), region = 81  ;;  %v941_v53 = vmax.f32 (!%p1145_p5), %v909_v41, 0.0  ;;  %972 = vst [vmem:[%s1673_s26 + $0x20] sm:$0xff] (!%p1145_p5), %v940_v48  ;;  %974 = vst [vmem:[%s1673_s26 + $0x30] sm:$0xff] (!%p1145_p5), %v942_v54 }
 0x162   : > { %v811_v9 = vadd.f32 %v1207_v5, %v426_v1  ;;  %v827_v10 = vadd.f32 %v1223_v6, %v442_v2  ;;  %v718_v11 = vpop.f32.mrb[13].mxu0  ;;  %v782_v12 = vpop.f32.mrb[13].mxu1  ;;  %v883_v5 = vld [vmem:[#allocation2 + $0x90] sm:$0xff] (!%p1145_p5)  ;;  %v884_v6 = vld [vmem:[#allocation2 + $0x98] sm:$0xff] (!%p1145_p5)  ;;  %975 = vst [vmem:[%s1673_s26 + $0x38] sm:$0xff] (!%p1145_p5), %v943_v59 }
 0x163   : > { %v809_v15 = vadd.f32 %v718_v11, %v424_v3  ;;  %v825_v16 = vadd.f32 %v782_v12, %v440_v4  ;;  %v1208_v17 = vpop.f32.mrb[14].mxu0  ;;  %v1224_v18 = vpop.f32.mrb[14].mxu1  ;;  %v875_v45 = vld [vmem:[#allocation2 + $0x50] sm:$0xff] (!%p1145_p5)  ;;  %973 = vst [vmem:[%s1673_s26 + $0x28] sm:$0xff] (!%p1145_p5), %v941_v53  ;;  %v886_v12 = vld [vmem:[#allocation2 + $0xa8] sm:$0xff] (!%p1145_p5) }
 0x164   : > { %843 = vst [vmem:[#allocation2 + $0x70] sm:$0xff] %v811_v9  ;;  %859 = vst [vmem:[#allocation2 + $0xf0] sm:$0xff] %v827_v10  ;;  %v812_v19 = vadd.f32 %v1208_v17, %v427_v7  ;;  %v828_v20 = vadd.f32 %v1224_v18, %v443_v8  ;;  %v721_v21 = vpop.f32.mrb[15].mxu0  ;;  %v785_v22 = vpop.f32.mrb[15].mxu1  ;;  %v873_v43 = vld [vmem:[#allocation2 + $0x40] sm:$0xff] (!%p1145_p5)  ;;  %v914_v60 = vadd.f32 (!%p1145_p5), %v1704_v26, %v875_v45  ;;  %v888_v18 = vld [vmem:[#allocation2 + $0xb8] sm:$0xff] (!%p1145_p5) }
 0x165   : > { %841 = vst [vmem:[#allocation2 + $0x60] sm:$0xff] %v809_v15  ;;  %857 = vst [vmem:[#allocation2 + $0xe0] sm:$0xff] %v825_v16  ;;  %v810_v23 = vadd.f32 %v721_v21, %v425_v13  ;;  %v826_v24 = vadd.f32 %v785_v22, %v441_v14  ;;  %v876_v50 = vld [vmem:[#allocation2 + $0x58] sm:$0xff] (!%p1145_p5)  ;;  %v912_v55 = vadd.f32 (!%p1145_p5), %v1704_v26, %v873_v43  ;;  %v885_v7 = vld [vmem:[#allocation2 + $0xa0] sm:$0xff] (!%p1145_p5) }
 0x166   : > { %844 = vst [vmem:[#allocation2 + $0x78] sm:$0xff] %v812_v19  ;;  %860 = vst [vmem:[#allocation2 + $0xf8] sm:$0xff] %v828_v20  ;;  %v874_v44 = vld [vmem:[#allocation2 + $0x48] sm:$0xff] (!%p1145_p5)  ;;  %v915_v61 = vadd.f32 (!%p1145_p5), %v1704_v26, %v876_v50  ;;  %v946_v8 = vmax.f32 (!%p1145_p5), %v914_v60, 0.0  ;;  %v887_v13 = vld [vmem:[#allocation2 + $0xb0] sm:$0xff] (!%p1145_p5)  ;;  %v920_v16 = vadd.f32 (!%p1145_p5), %v1704_v26, %v881_v63  ;;  %v921_v17 = vadd.f32 (!%p1145_p5), %v1704_v26, %v882_v0 }
 0x167   : > { %842 = vst [vmem:[#allocation2 + $0x68] sm:$0xff] %v810_v23  ;;  %858 = vst [vmem:[#allocation2 + $0xe8] sm:$0xff] %v826_v24  ;;  %v913_v56 = vadd.f32 (!%p1145_p5), %v1704_v26, %v874_v44  ;;  %v944_v1 = vmax.f32 (!%p1145_p5), %v912_v55, 0.0  ;;  %v922_v20 = vadd.f32 (!%p1145_p5), %v1704_v26, %v883_v5  ;;  %v923_v21 = vadd.f32 (!%p1145_p5), %v1704_v26, %v884_v6  ;;  %v889_v23 = vld [vmem:[#allocation2 + $0xc0] sm:$0xff] (!%p1145_p5)  ;;  %v890_v24 = vld [vmem:[#allocation2 + $0xc8] sm:$0xff] (!%p1145_p5) }
 0x168   : > { %v947_v9 = vmax.f32 %v915_v61, 0.0  ;;  %978 = vst [vmem:[%s1673_s26 + $0x50] sm:$0xff] %v946_v8  ;;  %v924_v22 = vadd.f32 %v1704_v26, %v885_v7  ;;  %v952_v25 = vmax.f32 %v920_v16, 0.0  ;;  %v953_v27 = vmax.f32 %v921_v17, 0.0  ;;  %v891_v30 = vld [vmem:[#allocation2 + $0xd0] sm:$0xff]  ;;  %v892_v31 = vld [vmem:[#allocation2 + $0xd8] sm:$0xff] }
 0x169   : > { %v945_v2 = vmax.f32 %v913_v56, 0.0  ;;  %976 = vst [vmem:[%s1673_s26 + $0x40] sm:$0xff] %v944_v1  ;;  %v925_v28 = vadd.f32 %v1704_v26, %v886_v12  ;;  %v926_v29 = vadd.f32 %v1704_v26, %v887_v13  ;;  %v954_v33 = vmax.f32 %v922_v20, 0.0 }
 0x16a   : > { %979 = vst [vmem:[%s1673_s26 + $0x58] sm:$0xff] %v947_v9  ;;  %v955_v34 = vmax.f32 %v923_v21, 0.0  ;;  %v956_v35 = vmax.f32 %v924_v22, 0.0  ;;  %v927_v36 = vadd.f32 %v1704_v26, %v888_v18  ;;  %984 = vst [vmem:[%s1673_s26 + $0x80] sm:$0xff] %v952_v25  ;;  %v928_v41 = vadd.f32 %v1704_v26, %v889_v23 }
 0x16b   : > { %v879_v57 = vld [vmem:[#allocation2 + $0x70] sm:$0xff]  ;;  %977 = vst [vmem:[%s1673_s26 + $0x48] sm:$0xff] %v945_v2  ;;  %985 = vst [vmem:[%s1673_s26 + $0x88] sm:$0xff] %v953_v27  ;;  %v957_v39 = vmax.f32 %v925_v28, 0.0  ;;  %v958_v40 = vmax.f32 %v926_v29, 0.0  ;;  %v929_v42 = vadd.f32 %v1704_v26, %v890_v24  ;;  %v930_v45 = vadd.f32 %v1704_v26, %v891_v30 }
 0x16c   : > { %v877_v51 = vld [vmem:[#allocation2 + $0x60] sm:$0xff]  ;;  %v918_v4 = vadd.f32 %v1704_v26, %v879_v57  ;;  %v895_v38 = vld [vmem:[#allocation2 + $0xf0] sm:$0xff]  ;;  %986 = vst [vmem:[%s1673_s26 + $0x90] sm:$0xff] %v954_v33  ;;  %987 = vst [vmem:[%s1673_s26 + $0x98] sm:$0xff] %v955_v34  ;;  %v959_v44 = vmax.f32 %v927_v36, 0.0  ;;  %v931_v46 = vadd.f32 %v1704_v26, %v892_v31  ;;  %v960_v48 = vmax.f32 %v928_v41, 0.0 }
 0x16d   : > { %v880_v58 = vld [vmem:[#allocation2 + $0x78] sm:$0xff]  ;;  %v916_v62 = vadd.f32 %v1704_v26, %v877_v51  ;;  %v893_v32 = vld [vmem:[#allocation2 + $0xe0] sm:$0xff]  ;;  %988 = vst [vmem:[%s1673_s26 + $0xa0] sm:$0xff] %v956_v35  ;;  %989 = vst [vmem:[%s1673_s26 + $0xa8] sm:$0xff] %v957_v39  ;;  %v961_v49 = vmax.f32 %v929_v42, 0.0  ;;  %v934_v51 = vadd.f32 %v1704_v26, %v895_v38 }
 0x16e   : > { %v878_v52 = vld [vmem:[#allocation2 + $0x68] sm:$0xff]  ;;  %v919_v11 = vadd.f32 %v1704_v26, %v880_v58  ;;  %v950_v15 = vmax.f32 %v918_v4, 0.0  ;;  %v896_v43 = vld [vmem:[#allocation2 + $0xf8] sm:$0xff]  ;;  %v932_v47 = vadd.f32 %v1704_v26, %v893_v32  ;;  %990 = vst [vmem:[%s1673_s26 + $0xb0] sm:$0xff] %v958_v40  ;;  %991 = vst [vmem:[%s1673_s26 + $0xb8] sm:$0xff] %v959_v44  ;;  %v963_v53 = vmax.f32 %v931_v46, 0.0 }
 0x16f   : > { %v917_v3 = vadd.f32 %v1704_v26, %v878_v52  ;;  %v948_v10 = vmax.f32 %v916_v62, 0.0  ;;  %v894_v37 = vld [vmem:[#allocation2 + $0xe8] sm:$0xff]  ;;  %v962_v52 = vmax.f32 %v930_v45, 0.0  ;;  %v935_v55 = vadd.f32 %v1704_v26, %v896_v43  ;;  %992 = vst [vmem:[%s1673_s26 + $0xc0] sm:$0xff] %v960_v48  ;;  %993 = vst [vmem:[%s1673_s26 + $0xc8] sm:$0xff] %v961_v49 }
 0x170   : > { %v951_v19 = vmax.f32 %v919_v11, 0.0  ;;  %982 = vst [vmem:[%s1673_s26 + $0x70] sm:$0xff] %v950_v15  ;;  %v933_v50 = vadd.f32 %v1704_v26, %v894_v37  ;;  %v964_v54 = vmax.f32 %v932_v47, 0.0  ;;  %v966_v57 = vmax.f32 %v934_v51, 0.0  ;;  %995 = vst [vmem:[%s1673_s26 + $0xd8] sm:$0xff] %v963_v53 }
 0x171   : > { %v949_v14 = vmax.f32 %v917_v3, 0.0  ;;  %980 = vst [vmem:[%s1673_s26 + $0x60] sm:$0xff] %v948_v10  ;;  %994 = vst [vmem:[%s1673_s26 + $0xd0] sm:$0xff] %v962_v52  ;;  %v967_v58 = vmax.f32 %v935_v55, 0.0 }
 0x172   : > { %983 = vst [vmem:[%s1673_s26 + $0x78] sm:$0xff] %v951_v19  ;;  %v965_v56 = vmax.f32 %v933_v50, 0.0  ;;  %996 = vst [vmem:[%s1673_s26 + $0xe0] sm:$0xff] %v964_v54 }
 0x173   : > { %981 = vst [vmem:[%s1673_s26 + $0x68] sm:$0xff] %v949_v14  ;;  %998 = vst [vmem:[%s1673_s26 + $0xf0] sm:$0xff] %v966_v57 }
 0x174   : > { %997 = vst [vmem:[%s1673_s26 + $0xe8] sm:$0xff] %v965_v56  ;;  %999 = vst [vmem:[%s1673_s26 + $0xf8] sm:$0xff] %v967_v58 }
 0x175 PF: > { %s1152_s17 = sshll.u32 %s1454_s18, 12  ;;  %s1014_s22 = sshll.u32 %s1673_s26, 4  ;;  %s1777_s22 = int_to_ptr.vmem [resolvable:$true] %s1014_s22 }
 0x176   : > { %s1774_s11 = scalar_lea.hbm %s1842_s3, %s1152_s17  ;;  %s1781_s23 = scalar_lea.sflag [#allocation5], %s364_s5 }
 0x177   : > { %s1356_s27 = scalar_lea.vmem %s1777_s22, 4096  ;;  %s1469_s18 = smov [#allocation4]  }
 0x178   : > { %p1357_p6 = scmp.ne.s32.totalorder %s1777_s22, %s1356_s27  ;;  %s1360_s4 = sshll.u32 %s1469_s18, 4  ;;  %s1361_s4 = int_to_ptr.vmem [resolvable:$false] %s1360_s4 }
 0x179   : > { %s1362_s29 = scalar_lea.vmem %s1361_s4, 8192  ;;  %p1363_p10 = scmp.lt.s32.totalorder %s1777_s22, %s1361_s4 }
 0x17a   : > { %p1358_p8 = pnand %p1357_p6, %p1564_p7  ;;  %p1364_p11 = scmp.lt.s32.totalorder %s1362_s29, %s1356_s27 }
 0x17c   : > { %p1359_p9 = pneg %p1358_p8  ;;  %p1365_p13 = por %p1364_p11, %p1363_p10 }
 0x17e   : > { %p1366_p0 = pnand %p1365_p13, %p1359_p9 }
 0x180   : > { %1369 = shalt.err (!%p1366_p0)
}
 0x181   : > { %s1370_s5 = scalar_lea.hbm %s1774_s11, 4096  ;;  %s1374_s28 = scalar_lea.hbm %s1842_s3, 8192 }
 0x182   : > { %p1371_p1 = scmp.ne.s32.totalorder %s1774_s11, %s1370_s5  ;;  %p1375_p4 = scmp.lt.u32.totalorder %s1774_s11, %s1842_s3 }
 0x183   : > { %p1376_p5 = scmp.lt.u32.totalorder %s1374_s28, %s1370_s5  ;;  %p1378_p8 = scmp.lt.u32.totalorder %s1370_s5, %s1774_s11 }
 0x184   : > { %p1372_p2 = pnand %p1371_p1, %p1564_p7 }
 0x185   : > { %p1377_p6 = por %p1376_p5, %p1375_p4 }
 0x186   : > { %p1373_p3 = pneg %p1372_p2 }
 0x187   : > { %p1379_p9 = por %p1378_p8, %p1377_p6 }
 0x189   : > { %p1380_p10 = pnand %p1379_p9, %p1373_p3 }
 0x18b   : > { %1383 = shalt.err (!%p1380_p10)
}
 0x18c   : > { %s1470_s10 = smov 128   ;;  %s1471_s27 = smov 8  }
 0x18d   : > { %1242 = dma.vmem_to_hbm [thread:$0]  (%p1564_p7), %s1777_s22, 4096, %s1774_s11, %s1781_s23, %s1470_s10, %s1470_s10, %s1471_s27  }
 0x18e PF: > { %p1248_p11 = scmp.ge.s32.totalorder %s1466_s21, 2  ;;  %s1029_s18 = sand.u32 1, %s1430_s12  }
 0x18f   : > { %s1030_s4 = scalar_lea.sflag [#allocation5], %s1029_s18 }
 0x190   : > { %p1245_p13 = pnand %p1248_p11, %p1572_p12 }
 0x192   : > { %1425 = dma.done.wait (!%p1245_p13), %s1030_s4, 4096  }
 0x193   : > { %1427 = vsyncadd (!%p1245_p13), %s1030_s4, 4294963200  ;;  %s16_s21 = sadd.s32 1, %s1466_s21   ;;  %s1846_s12 = smov %s1434_s13 }
 0x194   : > { %p13_p0 = scmp.ge.s32.totalorder %s16_s21, 12   ;;  %s1847_s13 = smov %s1438_s14 }
 0x195   : > { %s1848_s14 = smov %s1577_s7  ;;  %s1849_s15 = smov %s1446_s16 }
 0x196   : > { %s1850_s16 = smov %s1580_s8  ;;  %s1851_s17 = smov %s1458_s19 }
 0x197   : > { %s1852_s18 = smov %s1462_s20  ;;  %s1853_s19 = smov %s1856_s24 }
 0x198   : > { %s1854_s20 = smov %s1860_s25  ;;  %15 = sbr.rel (!%p13_p0) target bundleno = 6 (0x6), region = 124 }
 0x19f   :  { %1035 = vsyncpa [#allocation5], 1 }
 0x1a0   :  { %1037 = vsyncpa [#allocation5 + $0x1], 1 }

</bundles_post_ra>
